<compile_context>
chip_gen: v7x
topology: tpu7x:2x2x1
jax: 0.10.0
libtpu: 0.0.40
codegen_flags: <defaults>
</compile_context>

<pallas_src>
import jax
import jax.numpy as jnp
from jax import lax
from jax.experimental import pallas as pl
from jax.experimental.pallas import tpu as pltpu


def _lstm_tagger_kernel(sent_ref,    # SMEM (B, T) int32 token ids (scalar prefetch)
                        emb_ref,     # VMEM (V, 1, E) f32  embedding table
                        wih_ref,     # VMEM (E, 4H)  bf16  weight_ih_l0^T
                        whh_ref,     # VMEM (H, 4H)  bf16  weight_hh_l0^T
                        b_ref,       # VMEM (1, 4H)  f32   b_ih + b_hh
                        wout_ref,    # VMEM (H, C)   bf16  hidden2tag.weight^T
                        bout_ref,    # VMEM (1, C)   f32   hidden2tag.bias
                        out_ref,     # VMEM (T, B, C) f32  log-probs (softmax over axis 0)
                        x_scr,       # VMEM (T*B, E) f32   gathered embeddings
                        h_scr):      # VMEM (T*B, H) f32   per-step hidden states
    T, B, C = out_ref.shape
    H = whh_ref.shape[0]

    # 1) Embedding gather fused into the kernel (indices live in SMEM).
    for t in range(T):
        for b in range(B):
            x_scr[pl.ds(t * B + b, 1), :] = emb_ref[sent_ref[b, t]]

    # 2) Input projection for ALL timesteps in one M=T*B matmul; bias added once.
    #    (hoisted off the serial recurrence)
    x_all = x_scr[...].astype(jnp.bfloat16)                        # (T*B, E)
    gates_in = (jnp.dot(x_all, wih_ref[...],
                        preferred_element_type=jnp.float32)
                + b_ref[...])                                      # (T*B, 4H) f32

    # 3) Recurrence: fully unrolled; h/c stay in vregs in f32.  Only h @ W_hh sits
    #    on the serial chain; the h_scr stores are off that chain.
    h = jnp.zeros((B, H), jnp.float32)
    c = jnp.zeros((B, H), jnp.float32)
    for t in range(T):
        gates = gates_in[t * B:(t + 1) * B, :] + jnp.dot(
            h.astype(jnp.bfloat16), whh_ref[...],
            preferred_element_type=jnp.float32)                    # (B, 4H) f32
        i_g = jax.nn.sigmoid(gates[:, 0:H])
        f_g = jax.nn.sigmoid(gates[:, H:2 * H])
        g_g = jnp.tanh(gates[:, 2 * H:3 * H])
        o_g = jax.nn.sigmoid(gates[:, 3 * H:4 * H])
        c = f_g * c + i_g * g_g
        h = o_g * jnp.tanh(c)
        h_scr[pl.ds(t * B, B), :] = h

    # 4) Deferred output projection: one M=T*B matmul instead of T tiny ones.
    hs = h_scr[...].astype(jnp.bfloat16)                           # (T*B, H)
    tag = (jnp.dot(hs, wout_ref[...],
                   preferred_element_type=jnp.float32)
           + bout_ref[...])                                        # (T*B, C) f32

    # 5) log_softmax over the sequence axis (torch dim=1 of (B,T,C) == axis 0 here).
    #    Stage tag_space rows directly in out_ref, then normalize in place.
    for t in range(T):
        out_ref[t] = tag[t * B:(t + 1) * B, :]
    ts = out_ref[...]                                              # (T, B, C)
    m = jnp.max(ts, axis=0, keepdims=True)
    lse = jnp.log(jnp.sum(jnp.exp(ts - m), axis=0, keepdims=True)) + m
    out_ref[...] = ts - lse


@jax.jit
def lstm_tagger_forward(sentence, params):
    """sentence: (B, T) int32 token ids -> (B, C, T) float32 log-probs."""
    emb_table = params["embedding"].astype(jnp.float32)
    V, E = emb_table.shape
    H = params["w_hh"].shape[1]
    C = params["w_out"].shape[0]
    B, T = sentence.shape

    # Weight prep (layout glue): leading-axis gather layout for the table,
    # bf16 matmul weights, combined bias.
    emb3 = emb_table.reshape(V, 1, E)
    wih_t = jnp.transpose(params["w_ih"]).astype(jnp.bfloat16)      # (E, 4H)
    whh_t = jnp.transpose(params["w_hh"]).astype(jnp.bfloat16)      # (H, 4H)
    bias = (params["b_ih"] + params["b_hh"]).reshape(1, 4 * H).astype(jnp.float32)
    wout_t = jnp.transpose(params["w_out"]).astype(jnp.bfloat16)    # (H, C)
    bout = params["b_out"].reshape(1, C).astype(jnp.float32)

    out_tbc = pl.pallas_call(
        _lstm_tagger_kernel,
        out_shape=jax.ShapeDtypeStruct((T, B, C), jnp.float32),
        grid_spec=pltpu.PrefetchScalarGridSpec(
            num_scalar_prefetch=1,            # sentence -> SMEM, gathered in-kernel
            grid=(1,),
            in_specs=[
                pl.BlockSpec((V, 1, E), lambda i, sent: (0, 0, 0)),
                pl.BlockSpec((E, 4 * H), lambda i, sent: (0, 0)),
                pl.BlockSpec((H, 4 * H), lambda i, sent: (0, 0)),
                pl.BlockSpec((1, 4 * H), lambda i, sent: (0, 0)),
                pl.BlockSpec((H, C), lambda i, sent: (0, 0)),
                pl.BlockSpec((1, C), lambda i, sent: (0, 0)),
            ],
            out_specs=pl.BlockSpec((T, B, C), lambda i, sent: (0, 0, 0)),
            scratch_shapes=[
                pltpu.VMEM((T * B, E), jnp.float32),   # gathered embeddings
                pltpu.VMEM((T * B, H), jnp.float32),   # hidden states for projection
            ],
        ),
        compiler_params=pltpu.CompilerParams(
            dimension_semantics=("arbitrary",)),
    )(sentence, emb3, wih_t, whh_t, bias, wout_t, bout)

    # permute(0, 2, 1): kernel output (T, B, C) -> (B, C, T)
    return jnp.transpose(out_tbc, (1, 2, 0))


def lstm_tagger_reference(sentence, params):
    """Pure-JAX f32 reference mirroring the PyTorch forward exactly."""
    emb = jnp.take(params["embedding"], sentence, axis=0)            # (B, T, E)
    H = params["w_hh"].shape[1]
    w_ih_t = params["w_ih"].T
    w_hh_t = params["w_hh"].T
    bias = params["b_ih"] + params["b_hh"]

    def cell(carry, x_t):
        h, c = carry
        gates = x_t @ w_ih_t + h @ w_hh_t + bias
        i = jax.nn.sigmoid(gates[:, 0:H])
        f = jax.nn.sigmoid(gates[:, H:2 * H])
        g = jnp.tanh(gates[:, 2 * H:3 * H])
        o = jax.nn.sigmoid(gates[:, 3 * H:4 * H])
        c = f * c + i * g
        h = o * jnp.tanh(c)
        return (h, c), h

    B = sentence.shape[0]
    h0 = jnp.zeros((B, H), jnp.float32)
    c0 = jnp.zeros((B, H), jnp.float32)
    _, hs = lax.scan(cell, (h0, c0), jnp.transpose(emb, (1, 0, 2)))  # (T, B, H)
    output = jnp.transpose(hs, (1, 0, 2))                            # (B, T, H)
    tag_space = output @ params["w_out"].T + params["b_out"]         # (B, T, C)
    tag_scores = jax.nn.log_softmax(tag_space, axis=1)               # over seq axis
    return jnp.transpose(tag_scores, (0, 2, 1))                      # (B, C, T)


def init_params(key, vocab_size, embedding_dim, hidden_dim, num_tags):
    ks = jax.random.split(key, 7)
    s = 1.0 / float(hidden_dim) ** 0.5
    return {
        "embedding": jax.random.normal(ks[0], (vocab_size, embedding_dim),
                                       jnp.float32),
        "w_ih": jax.random.uniform(ks[1], (4 * hidden_dim, embedding_dim),
                                   jnp.float32, -s, s),
        "w_hh": jax.random.uniform(ks[2], (4 * hidden_dim, hidden_dim),
                                   jnp.float32, -s, s),
        "b_ih": jax.random.uniform(ks[3], (4 * hidden_dim,), jnp.float32, -s, s),
        "b_hh": jax.random.uniform(ks[4], (4 * hidden_dim,), jnp.float32, -s, s),
        "w_out": jax.random.uniform(ks[5], (num_tags, hidden_dim),
                                    jnp.float32, -s, s),
        "b_out": jax.random.uniform(ks[6], (num_tags,), jnp.float32, -s, s),
    }


if __name__ == "__main__":
    vocab_size = 120
    embedding_dim = 64
    hidden_dim = 128
    num_tags = 16
    batch = 2
    seq_len = 8

    key = jax.random.PRNGKey(0)
    pkey, skey = jax.random.split(key)
    params = init_params(pkey, vocab_size, embedding_dim, hidden_dim, num_tags)
    sentence = jax.random.randint(skey, (batch, seq_len), 0, vocab_size,
                                  dtype=jnp.int32)

    out = jax.block_until_ready(lstm_tagger_forward(sentence, params))
    ref = jax.block_until_ready(lstm_tagger_reference(sentence, params))

    assert out.shape == (batch, num_tags, seq_len), out.shape
    assert jnp.allclose(out, ref, atol=2e-2, rtol=2e-2), \
        float(jnp.max(jnp.abs(out - ref)))

    print("KERNEL_OK")
</pallas_src>

<mosaic_0001>
module attributes {stable_mosaic.version = 11 : i64} {
  func.func @_lstm_tagger_kernel(%arg0: i32, %arg1: memref<2x8xi32, #tpu.memory_space<smem>>, %arg2: memref<120x1x64xf32, #tpu.memory_space<vmem>>, %arg3: memref<64x512xbf16, #tpu.memory_space<vmem>>, %arg4: memref<128x512xbf16, #tpu.memory_space<vmem>>, %arg5: memref<1x512xf32, #tpu.memory_space<vmem>>, %arg6: memref<128x16xbf16, #tpu.memory_space<vmem>>, %arg7: memref<1x16xf32, #tpu.memory_space<vmem>>, %arg8: memref<8x2x16xf32, #tpu.memory_space<vmem>>, %arg9: memref<16x64xf32, #tpu.memory_space<vmem>>, %arg10: memref<16x128xf32, #tpu.memory_space<vmem>>) attributes {dimension_semantics = [#tpu.dimension_semantics<arbitrary>], iteration_bounds = array<i64: 1>, scalar_prefetch = 1 : i64, scratch_operands = 2 : i64, tpu.core_type = #tpu.core_type<tc>, window_params = [{pipeline_mode = #tpu.pipeline_mode<synchronous>, transform_indices = @transform_0, window_bounds = array<i64: 120, 1, 64>}, {pipeline_mode = #tpu.pipeline_mode<synchronous>, transform_indices = @transform_1, window_bounds = array<i64: 64, 512>}, {pipeline_mode = #tpu.pipeline_mode<synchronous>, transform_indices = @transform_2, window_bounds = array<i64: 128, 512>}, {pipeline_mode = #tpu.pipeline_mode<synchronous>, transform_indices = @transform_3, window_bounds = array<i64: 1, 512>}, {pipeline_mode = #tpu.pipeline_mode<synchronous>, transform_indices = @transform_4, window_bounds = array<i64: 128, 16>}, {pipeline_mode = #tpu.pipeline_mode<synchronous>, transform_indices = @transform_5, window_bounds = array<i64: 1, 16>}, {pipeline_mode = #tpu.pipeline_mode<synchronous>, transform_indices = @transform_6, window_bounds = array<i64: 8, 2, 16>}]} {
    %c0 = arith.constant 0 : index
    %c0_0 = arith.constant 0 : index
    %0 = memref.load %arg1[%c0, %c0_0] : memref<2x8xi32, #tpu.memory_space<smem>>
    %1 = arith.index_cast %0 : i32 to index
    %c0_1 = arith.constant 0 : index
    %c0_2 = arith.constant 0 : index
    %2 = vector.load %arg2[%1, %c0_1, %c0_2] : memref<120x1x64xf32, #tpu.memory_space<vmem>>, vector<1x1x64xf32>
    %3 = vector.shape_cast %2 : vector<1x1x64xf32> to vector<1x64xf32>
    %c0_3 = arith.constant 0 : index
    %c0_4 = arith.constant 0 : index
    %4 = vector.load %arg9[%c0_3, %c0_4] : memref<16x64xf32, #tpu.memory_space<vmem>>, vector<1x64xf32>
    tpu.vector_store %arg9[%c0_3, %c0_4], %3 {strides = array<i32>} : memref<16x64xf32, #tpu.memory_space<vmem>>, vector<1x64xf32>,
    %c1 = arith.constant 1 : index
    %c0_5 = arith.constant 0 : index
    %5 = memref.load %arg1[%c1, %c0_5] : memref<2x8xi32, #tpu.memory_space<smem>>
    %6 = arith.index_cast %5 : i32 to index
    %c0_6 = arith.constant 0 : index
    %c0_7 = arith.constant 0 : index
    %7 = vector.load %arg2[%6, %c0_6, %c0_7] : memref<120x1x64xf32, #tpu.memory_space<vmem>>, vector<1x1x64xf32>
    %8 = vector.shape_cast %7 : vector<1x1x64xf32> to vector<1x64xf32>
    %c1_8 = arith.constant 1 : index
    %c0_9 = arith.constant 0 : index
    %9 = vector.load %arg9[%c1_8, %c0_9] : memref<16x64xf32, #tpu.memory_space<vmem>>, vector<1x64xf32>
    tpu.vector_store %arg9[%c1_8, %c0_9], %8 {strides = array<i32>} : memref<16x64xf32, #tpu.memory_space<vmem>>, vector<1x64xf32>,
    %c0_10 = arith.constant 0 : index
    %c1_11 = arith.constant 1 : index
    %10 = memref.load %arg1[%c0_10, %c1_11] : memref<2x8xi32, #tpu.memory_space<smem>>
    %11 = arith.index_cast %10 : i32 to index
    %c0_12 = arith.constant 0 : index
    %c0_13 = arith.constant 0 : index
    %12 = vector.load %arg2[%11, %c0_12, %c0_13] : memref<120x1x64xf32, #tpu.memory_space<vmem>>, vector<1x1x64xf32>
    %13 = vector.shape_cast %12 : vector<1x1x64xf32> to vector<1x64xf32>
    %c2 = arith.constant 2 : index
    %c0_14 = arith.constant 0 : index
    %14 = vector.load %arg9[%c2, %c0_14] : memref<16x64xf32, #tpu.memory_space<vmem>>, vector<1x64xf32>
    tpu.vector_store %arg9[%c2, %c0_14], %13 {strides = array<i32>} : memref<16x64xf32, #tpu.memory_space<vmem>>, vector<1x64xf32>,
    %c1_15 = arith.constant 1 : index
    %c1_16 = arith.constant 1 : index
    %15 = memref.load %arg1[%c1_15, %c1_16] : memref<2x8xi32, #tpu.memory_space<smem>>
    %16 = arith.index_cast %15 : i32 to index
    %c0_17 = arith.constant 0 : index
    %c0_18 = arith.constant 0 : index
    %17 = vector.load %arg2[%16, %c0_17, %c0_18] : memref<120x1x64xf32, #tpu.memory_space<vmem>>, vector<1x1x64xf32>
    %18 = vector.shape_cast %17 : vector<1x1x64xf32> to vector<1x64xf32>
    %c3 = arith.constant 3 : index
    %c0_19 = arith.constant 0 : index
    %19 = vector.load %arg9[%c3, %c0_19] : memref<16x64xf32, #tpu.memory_space<vmem>>, vector<1x64xf32>
    tpu.vector_store %arg9[%c3, %c0_19], %18 {strides = array<i32>} : memref<16x64xf32, #tpu.memory_space<vmem>>, vector<1x64xf32>,
    %c0_20 = arith.constant 0 : index
    %c2_21 = arith.constant 2 : index
    %20 = memref.load %arg1[%c0_20, %c2_21] : memref<2x8xi32, #tpu.memory_space<smem>>
    %21 = arith.index_cast %20 : i32 to index
    %c0_22 = arith.constant 0 : index
    %c0_23 = arith.constant 0 : index
    %22 = vector.load %arg2[%21, %c0_22, %c0_23] : memref<120x1x64xf32, #tpu.memory_space<vmem>>, vector<1x1x64xf32>
    %23 = vector.shape_cast %22 : vector<1x1x64xf32> to vector<1x64xf32>
    %c4 = arith.constant 4 : index
    %c0_24 = arith.constant 0 : index
    %24 = vector.load %arg9[%c4, %c0_24] : memref<16x64xf32, #tpu.memory_space<vmem>>, vector<1x64xf32>
    tpu.vector_store %arg9[%c4, %c0_24], %23 {strides = array<i32>} : memref<16x64xf32, #tpu.memory_space<vmem>>, vector<1x64xf32>,
    %c1_25 = arith.constant 1 : index
    %c2_26 = arith.constant 2 : index
    %25 = memref.load %arg1[%c1_25, %c2_26] : memref<2x8xi32, #tpu.memory_space<smem>>
    %26 = arith.index_cast %25 : i32 to index
    %c0_27 = arith.constant 0 : index
    %c0_28 = arith.constant 0 : index
    %27 = vector.load %arg2[%26, %c0_27, %c0_28] : memref<120x1x64xf32, #tpu.memory_space<vmem>>, vector<1x1x64xf32>
    %28 = vector.shape_cast %27 : vector<1x1x64xf32> to vector<1x64xf32>
    %c5 = arith.constant 5 : index
    %c0_29 = arith.constant 0 : index
    %29 = vector.load %arg9[%c5, %c0_29] : memref<16x64xf32, #tpu.memory_space<vmem>>, vector<1x64xf32>
    tpu.vector_store %arg9[%c5, %c0_29], %28 {strides = array<i32>} : memref<16x64xf32, #tpu.memory_space<vmem>>, vector<1x64xf32>,
    %c0_30 = arith.constant 0 : index
    %c3_31 = arith.constant 3 : index
    %30 = memref.load %arg1[%c0_30, %c3_31] : memref<2x8xi32, #tpu.memory_space<smem>>
    %31 = arith.index_cast %30 : i32 to index
    %c0_32 = arith.constant 0 : index
    %c0_33 = arith.constant 0 : index
    %32 = vector.load %arg2[%31, %c0_32, %c0_33] : memref<120x1x64xf32, #tpu.memory_space<vmem>>, vector<1x1x64xf32>
    %33 = vector.shape_cast %32 : vector<1x1x64xf32> to vector<1x64xf32>
    %c6 = arith.constant 6 : index
    %c0_34 = arith.constant 0 : index
    %34 = vector.load %arg9[%c6, %c0_34] : memref<16x64xf32, #tpu.memory_space<vmem>>, vector<1x64xf32>
    tpu.vector_store %arg9[%c6, %c0_34], %33 {strides = array<i32>} : memref<16x64xf32, #tpu.memory_space<vmem>>, vector<1x64xf32>,
    %c1_35 = arith.constant 1 : index
    %c3_36 = arith.constant 3 : index
    %35 = memref.load %arg1[%c1_35, %c3_36] : memref<2x8xi32, #tpu.memory_space<smem>>
    %36 = arith.index_cast %35 : i32 to index
    %c0_37 = arith.constant 0 : index
    %c0_38 = arith.constant 0 : index
    %37 = vector.load %arg2[%36, %c0_37, %c0_38] : memref<120x1x64xf32, #tpu.memory_space<vmem>>, vector<1x1x64xf32>
    %38 = vector.shape_cast %37 : vector<1x1x64xf32> to vector<1x64xf32>
    %c7 = arith.constant 7 : index
    %c0_39 = arith.constant 0 : index
    %39 = vector.load %arg9[%c7, %c0_39] : memref<16x64xf32, #tpu.memory_space<vmem>>, vector<1x64xf32>
    tpu.vector_store %arg9[%c7, %c0_39], %38 {strides = array<i32>} : memref<16x64xf32, #tpu.memory_space<vmem>>, vector<1x64xf32>,
    %c0_40 = arith.constant 0 : index
    %c4_41 = arith.constant 4 : index
    %40 = memref.load %arg1[%c0_40, %c4_41] : memref<2x8xi32, #tpu.memory_space<smem>>
    %41 = arith.index_cast %40 : i32 to index
    %c0_42 = arith.constant 0 : index
    %c0_43 = arith.constant 0 : index
    %42 = vector.load %arg2[%41, %c0_42, %c0_43] : memref<120x1x64xf32, #tpu.memory_space<vmem>>, vector<1x1x64xf32>
    %43 = vector.shape_cast %42 : vector<1x1x64xf32> to vector<1x64xf32>
    %c8 = arith.constant 8 : index
    %c0_44 = arith.constant 0 : index
    %44 = vector.load %arg9[%c8, %c0_44] : memref<16x64xf32, #tpu.memory_space<vmem>>, vector<1x64xf32>
    tpu.vector_store %arg9[%c8, %c0_44], %43 {strides = array<i32>} : memref<16x64xf32, #tpu.memory_space<vmem>>, vector<1x64xf32>,
    %c1_45 = arith.constant 1 : index
    %c4_46 = arith.constant 4 : index
    %45 = memref.load %arg1[%c1_45, %c4_46] : memref<2x8xi32, #tpu.memory_space<smem>>
    %46 = arith.index_cast %45 : i32 to index
    %c0_47 = arith.constant 0 : index
    %c0_48 = arith.constant 0 : index
    %47 = vector.load %arg2[%46, %c0_47, %c0_48] : memref<120x1x64xf32, #tpu.memory_space<vmem>>, vector<1x1x64xf32>
    %48 = vector.shape_cast %47 : vector<1x1x64xf32> to vector<1x64xf32>
    %c9 = arith.constant 9 : index
    %c0_49 = arith.constant 0 : index
    %49 = vector.load %arg9[%c9, %c0_49] : memref<16x64xf32, #tpu.memory_space<vmem>>, vector<1x64xf32>
    tpu.vector_store %arg9[%c9, %c0_49], %48 {strides = array<i32>} : memref<16x64xf32, #tpu.memory_space<vmem>>, vector<1x64xf32>,
    %c0_50 = arith.constant 0 : index
    %c5_51 = arith.constant 5 : index
    %50 = memref.load %arg1[%c0_50, %c5_51] : memref<2x8xi32, #tpu.memory_space<smem>>
    %51 = arith.index_cast %50 : i32 to index
    %c0_52 = arith.constant 0 : index
    %c0_53 = arith.constant 0 : index
    %52 = vector.load %arg2[%51, %c0_52, %c0_53] : memref<120x1x64xf32, #tpu.memory_space<vmem>>, vector<1x1x64xf32>
    %53 = vector.shape_cast %52 : vector<1x1x64xf32> to vector<1x64xf32>
    %c10 = arith.constant 10 : index
    %c0_54 = arith.constant 0 : index
    %54 = vector.load %arg9[%c10, %c0_54] : memref<16x64xf32, #tpu.memory_space<vmem>>, vector<1x64xf32>
    tpu.vector_store %arg9[%c10, %c0_54], %53 {strides = array<i32>} : memref<16x64xf32, #tpu.memory_space<vmem>>, vector<1x64xf32>,
    %c1_55 = arith.constant 1 : index
    %c5_56 = arith.constant 5 : index
    %55 = memref.load %arg1[%c1_55, %c5_56] : memref<2x8xi32, #tpu.memory_space<smem>>
    %56 = arith.index_cast %55 : i32 to index
    %c0_57 = arith.constant 0 : index
    %c0_58 = arith.constant 0 : index
    %57 = vector.load %arg2[%56, %c0_57, %c0_58] : memref<120x1x64xf32, #tpu.memory_space<vmem>>, vector<1x1x64xf32>
    %58 = vector.shape_cast %57 : vector<1x1x64xf32> to vector<1x64xf32>
    %c11 = arith.constant 11 : index
    %c0_59 = arith.constant 0 : index
    %59 = vector.load %arg9[%c11, %c0_59] : memref<16x64xf32, #tpu.memory_space<vmem>>, vector<1x64xf32>
    tpu.vector_store %arg9[%c11, %c0_59], %58 {strides = array<i32>} : memref<16x64xf32, #tpu.memory_space<vmem>>, vector<1x64xf32>,
    %c0_60 = arith.constant 0 : index
    %c6_61 = arith.constant 6 : index
    %60 = memref.load %arg1[%c0_60, %c6_61] : memref<2x8xi32, #tpu.memory_space<smem>>
    %61 = arith.index_cast %60 : i32 to index
    %c0_62 = arith.constant 0 : index
    %c0_63 = arith.constant 0 : index
    %62 = vector.load %arg2[%61, %c0_62, %c0_63] : memref<120x1x64xf32, #tpu.memory_space<vmem>>, vector<1x1x64xf32>
    %63 = vector.shape_cast %62 : vector<1x1x64xf32> to vector<1x64xf32>
    %c12 = arith.constant 12 : index
    %c0_64 = arith.constant 0 : index
    %64 = vector.load %arg9[%c12, %c0_64] : memref<16x64xf32, #tpu.memory_space<vmem>>, vector<1x64xf32>
    tpu.vector_store %arg9[%c12, %c0_64], %63 {strides = array<i32>} : memref<16x64xf32, #tpu.memory_space<vmem>>, vector<1x64xf32>,
    %c1_65 = arith.constant 1 : index
    %c6_66 = arith.constant 6 : index
    %65 = memref.load %arg1[%c1_65, %c6_66] : memref<2x8xi32, #tpu.memory_space<smem>>
    %66 = arith.index_cast %65 : i32 to index
    %c0_67 = arith.constant 0 : index
    %c0_68 = arith.constant 0 : index
    %67 = vector.load %arg2[%66, %c0_67, %c0_68] : memref<120x1x64xf32, #tpu.memory_space<vmem>>, vector<1x1x64xf32>
    %68 = vector.shape_cast %67 : vector<1x1x64xf32> to vector<1x64xf32>
    %c13 = arith.constant 13 : index
    %c0_69 = arith.constant 0 : index
    %69 = vector.load %arg9[%c13, %c0_69] : memref<16x64xf32, #tpu.memory_space<vmem>>, vector<1x64xf32>
    tpu.vector_store %arg9[%c13, %c0_69], %68 {strides = array<i32>} : memref<16x64xf32, #tpu.memory_space<vmem>>, vector<1x64xf32>,
    %c0_70 = arith.constant 0 : index
    %c7_71 = arith.constant 7 : index
    %70 = memref.load %arg1[%c0_70, %c7_71] : memref<2x8xi32, #tpu.memory_space<smem>>
    %71 = arith.index_cast %70 : i32 to index
    %c0_72 = arith.constant 0 : index
    %c0_73 = arith.constant 0 : index
    %72 = vector.load %arg2[%71, %c0_72, %c0_73] : memref<120x1x64xf32, #tpu.memory_space<vmem>>, vector<1x1x64xf32>
    %73 = vector.shape_cast %72 : vector<1x1x64xf32> to vector<1x64xf32>
    %c14 = arith.constant 14 : index
    %c0_74 = arith.constant 0 : index
    %74 = vector.load %arg9[%c14, %c0_74] : memref<16x64xf32, #tpu.memory_space<vmem>>, vector<1x64xf32>
    tpu.vector_store %arg9[%c14, %c0_74], %73 {strides = array<i32>} : memref<16x64xf32, #tpu.memory_space<vmem>>, vector<1x64xf32>,
    %c1_75 = arith.constant 1 : index
    %c7_76 = arith.constant 7 : index
    %75 = memref.load %arg1[%c1_75, %c7_76] : memref<2x8xi32, #tpu.memory_space<smem>>
    %76 = arith.index_cast %75 : i32 to index
    %c0_77 = arith.constant 0 : index
    %c0_78 = arith.constant 0 : index
    %77 = vector.load %arg2[%76, %c0_77, %c0_78] : memref<120x1x64xf32, #tpu.memory_space<vmem>>, vector<1x1x64xf32>
    %78 = vector.shape_cast %77 : vector<1x1x64xf32> to vector<1x64xf32>
    %c15 = arith.constant 15 : index
    %c0_79 = arith.constant 0 : index
    %79 = vector.load %arg9[%c15, %c0_79] : memref<16x64xf32, #tpu.memory_space<vmem>>, vector<1x64xf32>
    tpu.vector_store %arg9[%c15, %c0_79], %78 {strides = array<i32>} : memref<16x64xf32, #tpu.memory_space<vmem>>, vector<1x64xf32>,
    %c0_80 = arith.constant 0 : index
    %c0_81 = arith.constant 0 : index
    %80 = vector.load %arg9[%c0_80, %c0_81] : memref<16x64xf32, #tpu.memory_space<vmem>>, vector<16x64xf32>
    %81 = arith.truncf %80 : vector<16x64xf32> to vector<16x64xbf16>
    %c0_82 = arith.constant 0 : index
    %c0_83 = arith.constant 0 : index
    %82 = vector.load %arg3[%c0_82, %c0_83] : memref<64x512xbf16, #tpu.memory_space<vmem>>, vector<64x512xbf16>
    %cst = arith.constant dense<0.000000e+00> : vector<16x512xf32>
    %83 = tpu.matmul %81, %82, %cst {dimension_numbers = #tpu.dot_dimension_numbers<[1], [0], [0], [1], [0, 0, 1, 1], [], []>} : vector<16x64xbf16>, vector<64x512xbf16>, vector<16x512xf32> -> vector<16x512xf32>
    %c0_84 = arith.constant 0 : index
    %c0_85 = arith.constant 0 : index
    %84 = vector.load %arg5[%c0_84, %c0_85] : memref<1x512xf32, #tpu.memory_space<vmem>>, vector<1x512xf32>
    %85 = vector.broadcast %84 : vector<1x512xf32> to vector<16x512xf32>
    %86 = arith.addf %83, %85 : vector<16x512xf32>
    %cst_86 = arith.constant 0.000000e+00 : f32
    %87 = vector.broadcast %cst_86 : f32 to vector<2x128xf32>
    %cst_87 = arith.constant 0.000000e+00 : f32
    %88 = vector.broadcast %cst_87 : f32 to vector<2x128xf32>
    %89 = vector.extract_strided_slice %86 {offsets = [0, 0], sizes = [2, 512], strides = [1, 1]} : vector<16x512xf32> to vector<2x512xf32>
    %90 = arith.truncf %87 : vector<2x128xf32> to vector<2x128xbf16>
    %c0_88 = arith.constant 0 : index
    %c0_89 = arith.constant 0 : index
    %91 = vector.load %arg4[%c0_88, %c0_89] : memref<128x512xbf16, #tpu.memory_space<vmem>>, vector<128x512xbf16>
    %cst_90 = arith.constant dense<0.000000e+00> : vector<2x512xf32>
    %92 = tpu.matmul %90, %91, %cst_90 {dimension_numbers = #tpu.dot_dimension_numbers<[1], [0], [0], [1], [0, 0, 1, 1], [], []>} : vector<2x128xbf16>, vector<128x512xbf16>, vector<2x512xf32> -> vector<2x512xf32>
    %93 = arith.addf %89, %92 : vector<2x512xf32>
    %94 = vector.extract_strided_slice %93 {offsets = [0, 0], sizes = [2, 128], strides = [1, 1]} : vector<2x512xf32> to vector<2x128xf32>
    %95 = arith.negf %94 : vector<2x128xf32>
    %96 = math.exp %95 : vector<2x128xf32>
    %cst_91 = arith.constant 1.000000e+00 : f32
    %97 = vector.broadcast %cst_91 : f32 to vector<2x128xf32>
    %98 = arith.addf %97, %96 : vector<2x128xf32>
    %99 = arith.divf %97, %98 : vector<2x128xf32>
    %100 = vector.extract_strided_slice %93 {offsets = [0, 128], sizes = [2, 128], strides = [1, 1]} : vector<2x512xf32> to vector<2x128xf32>
    %101 = arith.negf %100 : vector<2x128xf32>
    %102 = math.exp %101 : vector<2x128xf32>
    %cst_92 = arith.constant 1.000000e+00 : f32
    %103 = vector.broadcast %cst_92 : f32 to vector<2x128xf32>
    %104 = arith.addf %103, %102 : vector<2x128xf32>
    %105 = arith.divf %103, %104 : vector<2x128xf32>
    %106 = vector.extract_strided_slice %93 {offsets = [0, 256], sizes = [2, 128], strides = [1, 1]} : vector<2x512xf32> to vector<2x128xf32>
    %107 = math.tanh %106 : vector<2x128xf32>
    %108 = vector.extract_strided_slice %93 {offsets = [0, 384], sizes = [2, 128], strides = [1, 1]} : vector<2x512xf32> to vector<2x128xf32>
    %109 = arith.negf %108 : vector<2x128xf32>
    %110 = math.exp %109 : vector<2x128xf32>
    %cst_93 = arith.constant 1.000000e+00 : f32
    %111 = vector.broadcast %cst_93 : f32 to vector<2x128xf32>
    %112 = arith.addf %111, %110 : vector<2x128xf32>
    %113 = arith.divf %111, %112 : vector<2x128xf32>
    %114 = arith.mulf %105, %88 : vector<2x128xf32>
    %115 = arith.mulf %99, %107 : vector<2x128xf32>
    %116 = arith.addf %114, %115 : vector<2x128xf32>
    %117 = math.tanh %116 : vector<2x128xf32>
    %118 = arith.mulf %113, %117 : vector<2x128xf32>
    %c0_94 = arith.constant 0 : index
    %c0_95 = arith.constant 0 : index
    %119 = vector.load %arg10[%c0_94, %c0_95] : memref<16x128xf32, #tpu.memory_space<vmem>>, vector<2x128xf32>
    tpu.vector_store %arg10[%c0_94, %c0_95], %118 {strides = array<i32>} : memref<16x128xf32, #tpu.memory_space<vmem>>, vector<2x128xf32>,
    %120 = vector.extract_strided_slice %86 {offsets = [2, 0], sizes = [2, 512], strides = [1, 1]} : vector<16x512xf32> to vector<2x512xf32>
    %121 = arith.truncf %118 : vector<2x128xf32> to vector<2x128xbf16>
    %c0_96 = arith.constant 0 : index
    %c0_97 = arith.constant 0 : index
    %122 = vector.load %arg4[%c0_96, %c0_97] : memref<128x512xbf16, #tpu.memory_space<vmem>>, vector<128x512xbf16>
    %cst_98 = arith.constant dense<0.000000e+00> : vector<2x512xf32>
    %123 = tpu.matmul %121, %122, %cst_98 {dimension_numbers = #tpu.dot_dimension_numbers<[1], [0], [0], [1], [0, 0, 1, 1], [], []>} : vector<2x128xbf16>, vector<128x512xbf16>, vector<2x512xf32> -> vector<2x512xf32>
    %124 = arith.addf %120, %123 : vector<2x512xf32>
    %125 = vector.extract_strided_slice %124 {offsets = [0, 0], sizes = [2, 128], strides = [1, 1]} : vector<2x512xf32> to vector<2x128xf32>
    %126 = arith.negf %125 : vector<2x128xf32>
    %127 = math.exp %126 : vector<2x128xf32>
    %cst_99 = arith.constant 1.000000e+00 : f32
    %128 = vector.broadcast %cst_99 : f32 to vector<2x128xf32>
    %129 = arith.addf %128, %127 : vector<2x128xf32>
    %130 = arith.divf %128, %129 : vector<2x128xf32>
    %131 = vector.extract_strided_slice %124 {offsets = [0, 128], sizes = [2, 128], strides = [1, 1]} : vector<2x512xf32> to vector<2x128xf32>
    %132 = arith.negf %131 : vector<2x128xf32>
    %133 = math.exp %132 : vector<2x128xf32>
    %cst_100 = arith.constant 1.000000e+00 : f32
    %134 = vector.broadcast %cst_100 : f32 to vector<2x128xf32>
    %135 = arith.addf %134, %133 : vector<2x128xf32>
    %136 = arith.divf %134, %135 : vector<2x128xf32>
    %137 = vector.extract_strided_slice %124 {offsets = [0, 256], sizes = [2, 128], strides = [1, 1]} : vector<2x512xf32> to vector<2x128xf32>
    %138 = math.tanh %137 : vector<2x128xf32>
    %139 = vector.extract_strided_slice %124 {offsets = [0, 384], sizes = [2, 128], strides = [1, 1]} : vector<2x512xf32> to vector<2x128xf32>
    %140 = arith.negf %139 : vector<2x128xf32>
    %141 = math.exp %140 : vector<2x128xf32>
    %cst_101 = arith.constant 1.000000e+00 : f32
    %142 = vector.broadcast %cst_101 : f32 to vector<2x128xf32>
    %143 = arith.addf %142, %141 : vector<2x128xf32>
    %144 = arith.divf %142, %143 : vector<2x128xf32>
    %145 = arith.mulf %136, %116 : vector<2x128xf32>
    %146 = arith.mulf %130, %138 : vector<2x128xf32>
    %147 = arith.addf %145, %146 : vector<2x128xf32>
    %148 = math.tanh %147 : vector<2x128xf32>
    %149 = arith.mulf %144, %148 : vector<2x128xf32>
    %c2_102 = arith.constant 2 : index
    %c0_103 = arith.constant 0 : index
    %150 = vector.load %arg10[%c2_102, %c0_103] : memref<16x128xf32, #tpu.memory_space<vmem>>, vector<2x128xf32>
    tpu.vector_store %arg10[%c2_102, %c0_103], %149 {strides = array<i32>} : memref<16x128xf32, #tpu.memory_space<vmem>>, vector<2x128xf32>,
    %151 = vector.extract_strided_slice %86 {offsets = [4, 0], sizes = [2, 512], strides = [1, 1]} : vector<16x512xf32> to vector<2x512xf32>
    %152 = arith.truncf %149 : vector<2x128xf32> to vector<2x128xbf16>
    %c0_104 = arith.constant 0 : index
    %c0_105 = arith.constant 0 : index
    %153 = vector.load %arg4[%c0_104, %c0_105] : memref<128x512xbf16, #tpu.memory_space<vmem>>, vector<128x512xbf16>
    %cst_106 = arith.constant dense<0.000000e+00> : vector<2x512xf32>
    %154 = tpu.matmul %152, %153, %cst_106 {dimension_numbers = #tpu.dot_dimension_numbers<[1], [0], [0], [1], [0, 0, 1, 1], [], []>} : vector<2x128xbf16>, vector<128x512xbf16>, vector<2x512xf32> -> vector<2x512xf32>
    %155 = arith.addf %151, %154 : vector<2x512xf32>
    %156 = vector.extract_strided_slice %155 {offsets = [0, 0], sizes = [2, 128], strides = [1, 1]} : vector<2x512xf32> to vector<2x128xf32>
    %157 = arith.negf %156 : vector<2x128xf32>
    %158 = math.exp %157 : vector<2x128xf32>
    %cst_107 = arith.constant 1.000000e+00 : f32
    %159 = vector.broadcast %cst_107 : f32 to vector<2x128xf32>
    %160 = arith.addf %159, %158 : vector<2x128xf32>
    %161 = arith.divf %159, %160 : vector<2x128xf32>
    %162 = vector.extract_strided_slice %155 {offsets = [0, 128], sizes = [2, 128], strides = [1, 1]} : vector<2x512xf32> to vector<2x128xf32>
    %163 = arith.negf %162 : vector<2x128xf32>
    %164 = math.exp %163 : vector<2x128xf32>
    %cst_108 = arith.constant 1.000000e+00 : f32
    %165 = vector.broadcast %cst_108 : f32 to vector<2x128xf32>
    %166 = arith.addf %165, %164 : vector<2x128xf32>
    %167 = arith.divf %165, %166 : vector<2x128xf32>
    %168 = vector.extract_strided_slice %155 {offsets = [0, 256], sizes = [2, 128], strides = [1, 1]} : vector<2x512xf32> to vector<2x128xf32>
    %169 = math.tanh %168 : vector<2x128xf32>
    %170 = vector.extract_strided_slice %155 {offsets = [0, 384], sizes = [2, 128], strides = [1, 1]} : vector<2x512xf32> to vector<2x128xf32>
    %171 = arith.negf %170 : vector<2x128xf32>
    %172 = math.exp %171 : vector<2x128xf32>
    %cst_109 = arith.constant 1.000000e+00 : f32
    %173 = vector.broadcast %cst_109 : f32 to vector<2x128xf32>
    %174 = arith.addf %173, %172 : vector<2x128xf32>
    %175 = arith.divf %173, %174 : vector<2x128xf32>
    %176 = arith.mulf %167, %147 : vector<2x128xf32>
    %177 = arith.mulf %161, %169 : vector<2x128xf32>
    %178 = arith.addf %176, %177 : vector<2x128xf32>
    %179 = math.tanh %178 : vector<2x128xf32>
    %180 = arith.mulf %175, %179 : vector<2x128xf32>
    %c4_110 = arith.constant 4 : index
    %c0_111 = arith.constant 0 : index
    %181 = vector.load %arg10[%c4_110, %c0_111] : memref<16x128xf32, #tpu.memory_space<vmem>>, vector<2x128xf32>
    tpu.vector_store %arg10[%c4_110, %c0_111], %180 {strides = array<i32>} : memref<16x128xf32, #tpu.memory_space<vmem>>, vector<2x128xf32>,
    %182 = vector.extract_strided_slice %86 {offsets = [6, 0], sizes = [2, 512], strides = [1, 1]} : vector<16x512xf32> to vector<2x512xf32>
    %183 = arith.truncf %180 : vector<2x128xf32> to vector<2x128xbf16>
    %c0_112 = arith.constant 0 : index
    %c0_113 = arith.constant 0 : index
    %184 = vector.load %arg4[%c0_112, %c0_113] : memref<128x512xbf16, #tpu.memory_space<vmem>>, vector<128x512xbf16>
    %cst_114 = arith.constant dense<0.000000e+00> : vector<2x512xf32>
    %185 = tpu.matmul %183, %184, %cst_114 {dimension_numbers = #tpu.dot_dimension_numbers<[1], [0], [0], [1], [0, 0, 1, 1], [], []>} : vector<2x128xbf16>, vector<128x512xbf16>, vector<2x512xf32> -> vector<2x512xf32>
    %186 = arith.addf %182, %185 : vector<2x512xf32>
    %187 = vector.extract_strided_slice %186 {offsets = [0, 0], sizes = [2, 128], strides = [1, 1]} : vector<2x512xf32> to vector<2x128xf32>
    %188 = arith.negf %187 : vector<2x128xf32>
    %189 = math.exp %188 : vector<2x128xf32>
    %cst_115 = arith.constant 1.000000e+00 : f32
    %190 = vector.broadcast %cst_115 : f32 to vector<2x128xf32>
    %191 = arith.addf %190, %189 : vector<2x128xf32>
    %192 = arith.divf %190, %191 : vector<2x128xf32>
    %193 = vector.extract_strided_slice %186 {offsets = [0, 128], sizes = [2, 128], strides = [1, 1]} : vector<2x512xf32> to vector<2x128xf32>
    %194 = arith.negf %193 : vector<2x128xf32>
    %195 = math.exp %194 : vector<2x128xf32>
    %cst_116 = arith.constant 1.000000e+00 : f32
    %196 = vector.broadcast %cst_116 : f32 to vector<2x128xf32>
    %197 = arith.addf %196, %195 : vector<2x128xf32>
    %198 = arith.divf %196, %197 : vector<2x128xf32>
    %199 = vector.extract_strided_slice %186 {offsets = [0, 256], sizes = [2, 128], strides = [1, 1]} : vector<2x512xf32> to vector<2x128xf32>
    %200 = math.tanh %199 : vector<2x128xf32>
    %201 = vector.extract_strided_slice %186 {offsets = [0, 384], sizes = [2, 128], strides = [1, 1]} : vector<2x512xf32> to vector<2x128xf32>
    %202 = arith.negf %201 : vector<2x128xf32>
    %203 = math.exp %202 : vector<2x128xf32>
    %cst_117 = arith.constant 1.000000e+00 : f32
    %204 = vector.broadcast %cst_117 : f32 to vector<2x128xf32>
    %205 = arith.addf %204, %203 : vector<2x128xf32>
    %206 = arith.divf %204, %205 : vector<2x128xf32>
    %207 = arith.mulf %198, %178 : vector<2x128xf32>
    %208 = arith.mulf %192, %200 : vector<2x128xf32>
    %209 = arith.addf %207, %208 : vector<2x128xf32>
    %210 = math.tanh %209 : vector<2x128xf32>
    %211 = arith.mulf %206, %210 : vector<2x128xf32>
    %c6_118 = arith.constant 6 : index
    %c0_119 = arith.constant 0 : index
    %212 = vector.load %arg10[%c6_118, %c0_119] : memref<16x128xf32, #tpu.memory_space<vmem>>, vector<2x128xf32>
    tpu.vector_store %arg10[%c6_118, %c0_119], %211 {strides = array<i32>} : memref<16x128xf32, #tpu.memory_space<vmem>>, vector<2x128xf32>,
    %213 = vector.extract_strided_slice %86 {offsets = [8, 0], sizes = [2, 512], strides = [1, 1]} : vector<16x512xf32> to vector<2x512xf32>
    %214 = arith.truncf %211 : vector<2x128xf32> to vector<2x128xbf16>
    %c0_120 = arith.constant 0 : index
    %c0_121 = arith.constant 0 : index
    %215 = vector.load %arg4[%c0_120, %c0_121] : memref<128x512xbf16, #tpu.memory_space<vmem>>, vector<128x512xbf16>
    %cst_122 = arith.constant dense<0.000000e+00> : vector<2x512xf32>
    %216 = tpu.matmul %214, %215, %cst_122 {dimension_numbers = #tpu.dot_dimension_numbers<[1], [0], [0], [1], [0, 0, 1, 1], [], []>} : vector<2x128xbf16>, vector<128x512xbf16>, vector<2x512xf32> -> vector<2x512xf32>
    %217 = arith.addf %213, %216 : vector<2x512xf32>
    %218 = vector.extract_strided_slice %217 {offsets = [0, 0], sizes = [2, 128], strides = [1, 1]} : vector<2x512xf32> to vector<2x128xf32>
    %219 = arith.negf %218 : vector<2x128xf32>
    %220 = math.exp %219 : vector<2x128xf32>
    %cst_123 = arith.constant 1.000000e+00 : f32
    %221 = vector.broadcast %cst_123 : f32 to vector<2x128xf32>
    %222 = arith.addf %221, %220 : vector<2x128xf32>
    %223 = arith.divf %221, %222 : vector<2x128xf32>
    %224 = vector.extract_strided_slice %217 {offsets = [0, 128], sizes = [2, 128], strides = [1, 1]} : vector<2x512xf32> to vector<2x128xf32>
    %225 = arith.negf %224 : vector<2x128xf32>
    %226 = math.exp %225 : vector<2x128xf32>
    %cst_124 = arith.constant 1.000000e+00 : f32
    %227 = vector.broadcast %cst_124 : f32 to vector<2x128xf32>
    %228 = arith.addf %227, %226 : vector<2x128xf32>
    %229 = arith.divf %227, %228 : vector<2x128xf32>
    %230 = vector.extract_strided_slice %217 {offsets = [0, 256], sizes = [2, 128], strides = [1, 1]} : vector<2x512xf32> to vector<2x128xf32>
    %231 = math.tanh %230 : vector<2x128xf32>
    %232 = vector.extract_strided_slice %217 {offsets = [0, 384], sizes = [2, 128], strides = [1, 1]} : vector<2x512xf32> to vector<2x128xf32>
    %233 = arith.negf %232 : vector<2x128xf32>
    %234 = math.exp %233 : vector<2x128xf32>
    %cst_125 = arith.constant 1.000000e+00 : f32
    %235 = vector.broadcast %cst_125 : f32 to vector<2x128xf32>
    %236 = arith.addf %235, %234 : vector<2x128xf32>
    %237 = arith.divf %235, %236 : vector<2x128xf32>
    %238 = arith.mulf %229, %209 : vector<2x128xf32>
    %239 = arith.mulf %223, %231 : vector<2x128xf32>
    %240 = arith.addf %238, %239 : vector<2x128xf32>
    %241 = math.tanh %240 : vector<2x128xf32>
    %242 = arith.mulf %237, %241 : vector<2x128xf32>
    %c8_126 = arith.constant 8 : index
    %c0_127 = arith.constant 0 : index
    %243 = vector.load %arg10[%c8_126, %c0_127] : memref<16x128xf32, #tpu.memory_space<vmem>>, vector<2x128xf32>
    tpu.vector_store %arg10[%c8_126, %c0_127], %242 {strides = array<i32>} : memref<16x128xf32, #tpu.memory_space<vmem>>, vector<2x128xf32>,
    %244 = vector.extract_strided_slice %86 {offsets = [10, 0], sizes = [2, 512], strides = [1, 1]} : vector<16x512xf32> to vector<2x512xf32>
    %245 = arith.truncf %242 : vector<2x128xf32> to vector<2x128xbf16>
    %c0_128 = arith.constant 0 : index
    %c0_129 = arith.constant 0 : index
    %246 = vector.load %arg4[%c0_128, %c0_129] : memref<128x512xbf16, #tpu.memory_space<vmem>>, vector<128x512xbf16>
    %cst_130 = arith.constant dense<0.000000e+00> : vector<2x512xf32>
    %247 = tpu.matmul %245, %246, %cst_130 {dimension_numbers = #tpu.dot_dimension_numbers<[1], [0], [0], [1], [0, 0, 1, 1], [], []>} : vector<2x128xbf16>, vector<128x512xbf16>, vector<2x512xf32> -> vector<2x512xf32>
    %248 = arith.addf %244, %247 : vector<2x512xf32>
    %249 = vector.extract_strided_slice %248 {offsets = [0, 0], sizes = [2, 128], strides = [1, 1]} : vector<2x512xf32> to vector<2x128xf32>
    %250 = arith.negf %249 : vector<2x128xf32>
    %251 = math.exp %250 : vector<2x128xf32>
    %cst_131 = arith.constant 1.000000e+00 : f32
    %252 = vector.broadcast %cst_131 : f32 to vector<2x128xf32>
    %253 = arith.addf %252, %251 : vector<2x128xf32>
    %254 = arith.divf %252, %253 : vector<2x128xf32>
    %255 = vector.extract_strided_slice %248 {offsets = [0, 128], sizes = [2, 128], strides = [1, 1]} : vector<2x512xf32> to vector<2x128xf32>
    %256 = arith.negf %255 : vector<2x128xf32>
    %257 = math.exp %256 : vector<2x128xf32>
    %cst_132 = arith.constant 1.000000e+00 : f32
    %258 = vector.broadcast %cst_132 : f32 to vector<2x128xf32>
    %259 = arith.addf %258, %257 : vector<2x128xf32>
    %260 = arith.divf %258, %259 : vector<2x128xf32>
    %261 = vector.extract_strided_slice %248 {offsets = [0, 256], sizes = [2, 128], strides = [1, 1]} : vector<2x512xf32> to vector<2x128xf32>
    %262 = math.tanh %261 : vector<2x128xf32>
    %263 = vector.extract_strided_slice %248 {offsets = [0, 384], sizes = [2, 128], strides = [1, 1]} : vector<2x512xf32> to vector<2x128xf32>
    %264 = arith.negf %263 : vector<2x128xf32>
    %265 = math.exp %264 : vector<2x128xf32>
    %cst_133 = arith.constant 1.000000e+00 : f32
    %266 = vector.broadcast %cst_133 : f32 to vector<2x128xf32>
    %267 = arith.addf %266, %265 : vector<2x128xf32>
    %268 = arith.divf %266, %267 : vector<2x128xf32>
    %269 = arith.mulf %260, %240 : vector<2x128xf32>
    %270 = arith.mulf %254, %262 : vector<2x128xf32>
    %271 = arith.addf %269, %270 : vector<2x128xf32>
    %272 = math.tanh %271 : vector<2x128xf32>
    %273 = arith.mulf %268, %272 : vector<2x128xf32>
    %c10_134 = arith.constant 10 : index
    %c0_135 = arith.constant 0 : index
    %274 = vector.load %arg10[%c10_134, %c0_135] : memref<16x128xf32, #tpu.memory_space<vmem>>, vector<2x128xf32>
    tpu.vector_store %arg10[%c10_134, %c0_135], %273 {strides = array<i32>} : memref<16x128xf32, #tpu.memory_space<vmem>>, vector<2x128xf32>,
    %275 = vector.extract_strided_slice %86 {offsets = [12, 0], sizes = [2, 512], strides = [1, 1]} : vector<16x512xf32> to vector<2x512xf32>
    %276 = arith.truncf %273 : vector<2x128xf32> to vector<2x128xbf16>
    %c0_136 = arith.constant 0 : index
    %c0_137 = arith.constant 0 : index
    %277 = vector.load %arg4[%c0_136, %c0_137] : memref<128x512xbf16, #tpu.memory_space<vmem>>, vector<128x512xbf16>
    %cst_138 = arith.constant dense<0.000000e+00> : vector<2x512xf32>
    %278 = tpu.matmul %276, %277, %cst_138 {dimension_numbers = #tpu.dot_dimension_numbers<[1], [0], [0], [1], [0, 0, 1, 1], [], []>} : vector<2x128xbf16>, vector<128x512xbf16>, vector<2x512xf32> -> vector<2x512xf32>
    %279 = arith.addf %275, %278 : vector<2x512xf32>
    %280 = vector.extract_strided_slice %279 {offsets = [0, 0], sizes = [2, 128], strides = [1, 1]} : vector<2x512xf32> to vector<2x128xf32>
    %281 = arith.negf %280 : vector<2x128xf32>
    %282 = math.exp %281 : vector<2x128xf32>
    %cst_139 = arith.constant 1.000000e+00 : f32
    %283 = vector.broadcast %cst_139 : f32 to vector<2x128xf32>
    %284 = arith.addf %283, %282 : vector<2x128xf32>
    %285 = arith.divf %283, %284 : vector<2x128xf32>
    %286 = vector.extract_strided_slice %279 {offsets = [0, 128], sizes = [2, 128], strides = [1, 1]} : vector<2x512xf32> to vector<2x128xf32>
    %287 = arith.negf %286 : vector<2x128xf32>
    %288 = math.exp %287 : vector<2x128xf32>
    %cst_140 = arith.constant 1.000000e+00 : f32
    %289 = vector.broadcast %cst_140 : f32 to vector<2x128xf32>
    %290 = arith.addf %289, %288 : vector<2x128xf32>
    %291 = arith.divf %289, %290 : vector<2x128xf32>
    %292 = vector.extract_strided_slice %279 {offsets = [0, 256], sizes = [2, 128], strides = [1, 1]} : vector<2x512xf32> to vector<2x128xf32>
    %293 = math.tanh %292 : vector<2x128xf32>
    %294 = vector.extract_strided_slice %279 {offsets = [0, 384], sizes = [2, 128], strides = [1, 1]} : vector<2x512xf32> to vector<2x128xf32>
    %295 = arith.negf %294 : vector<2x128xf32>
    %296 = math.exp %295 : vector<2x128xf32>
    %cst_141 = arith.constant 1.000000e+00 : f32
    %297 = vector.broadcast %cst_141 : f32 to vector<2x128xf32>
    %298 = arith.addf %297, %296 : vector<2x128xf32>
    %299 = arith.divf %297, %298 : vector<2x128xf32>
    %300 = arith.mulf %291, %271 : vector<2x128xf32>
    %301 = arith.mulf %285, %293 : vector<2x128xf32>
    %302 = arith.addf %300, %301 : vector<2x128xf32>
    %303 = math.tanh %302 : vector<2x128xf32>
    %304 = arith.mulf %299, %303 : vector<2x128xf32>
    %c12_142 = arith.constant 12 : index
    %c0_143 = arith.constant 0 : index
    %305 = vector.load %arg10[%c12_142, %c0_143] : memref<16x128xf32, #tpu.memory_space<vmem>>, vector<2x128xf32>
    tpu.vector_store %arg10[%c12_142, %c0_143], %304 {strides = array<i32>} : memref<16x128xf32, #tpu.memory_space<vmem>>, vector<2x128xf32>,
    %306 = vector.extract_strided_slice %86 {offsets = [14, 0], sizes = [2, 512], strides = [1, 1]} : vector<16x512xf32> to vector<2x512xf32>
    %307 = arith.truncf %304 : vector<2x128xf32> to vector<2x128xbf16>
    %c0_144 = arith.constant 0 : index
    %c0_145 = arith.constant 0 : index
    %308 = vector.load %arg4[%c0_144, %c0_145] : memref<128x512xbf16, #tpu.memory_space<vmem>>, vector<128x512xbf16>
    %cst_146 = arith.constant dense<0.000000e+00> : vector<2x512xf32>
    %309 = tpu.matmul %307, %308, %cst_146 {dimension_numbers = #tpu.dot_dimension_numbers<[1], [0], [0], [1], [0, 0, 1, 1], [], []>} : vector<2x128xbf16>, vector<128x512xbf16>, vector<2x512xf32> -> vector<2x512xf32>
    %310 = arith.addf %306, %309 : vector<2x512xf32>
    %311 = vector.extract_strided_slice %310 {offsets = [0, 0], sizes = [2, 128], strides = [1, 1]} : vector<2x512xf32> to vector<2x128xf32>
    %312 = arith.negf %311 : vector<2x128xf32>
    %313 = math.exp %312 : vector<2x128xf32>
    %cst_147 = arith.constant 1.000000e+00 : f32
    %314 = vector.broadcast %cst_147 : f32 to vector<2x128xf32>
    %315 = arith.addf %314, %313 : vector<2x128xf32>
    %316 = arith.divf %314, %315 : vector<2x128xf32>
    %317 = vector.extract_strided_slice %310 {offsets = [0, 128], sizes = [2, 128], strides = [1, 1]} : vector<2x512xf32> to vector<2x128xf32>
    %318 = arith.negf %317 : vector<2x128xf32>
    %319 = math.exp %318 : vector<2x128xf32>
    %cst_148 = arith.constant 1.000000e+00 : f32
    %320 = vector.broadcast %cst_148 : f32 to vector<2x128xf32>
    %321 = arith.addf %320, %319 : vector<2x128xf32>
    %322 = arith.divf %320, %321 : vector<2x128xf32>
    %323 = vector.extract_strided_slice %310 {offsets = [0, 256], sizes = [2, 128], strides = [1, 1]} : vector<2x512xf32> to vector<2x128xf32>
    %324 = math.tanh %323 : vector<2x128xf32>
    %325 = vector.extract_strided_slice %310 {offsets = [0, 384], sizes = [2, 128], strides = [1, 1]} : vector<2x512xf32> to vector<2x128xf32>
    %326 = arith.negf %325 : vector<2x128xf32>
    %327 = math.exp %326 : vector<2x128xf32>
    %cst_149 = arith.constant 1.000000e+00 : f32
    %328 = vector.broadcast %cst_149 : f32 to vector<2x128xf32>
    %329 = arith.addf %328, %327 : vector<2x128xf32>
    %330 = arith.divf %328, %329 : vector<2x128xf32>
    %331 = arith.mulf %322, %302 : vector<2x128xf32>
    %332 = arith.mulf %316, %324 : vector<2x128xf32>
    %333 = arith.addf %331, %332 : vector<2x128xf32>
    %334 = math.tanh %333 : vector<2x128xf32>
    %335 = arith.mulf %330, %334 : vector<2x128xf32>
    %c14_150 = arith.constant 14 : index
    %c0_151 = arith.constant 0 : index
    %336 = vector.load %arg10[%c14_150, %c0_151] : memref<16x128xf32, #tpu.memory_space<vmem>>, vector<2x128xf32>
    tpu.vector_store %arg10[%c14_150, %c0_151], %335 {strides = array<i32>} : memref<16x128xf32, #tpu.memory_space<vmem>>, vector<2x128xf32>,
    %c0_152 = arith.constant 0 : index
    %c0_153 = arith.constant 0 : index
    %337 = vector.load %arg10[%c0_152, %c0_153] : memref<16x128xf32, #tpu.memory_space<vmem>>, vector<16x128xf32>
    %338 = arith.truncf %337 : vector<16x128xf32> to vector<16x128xbf16>
    %c0_154 = arith.constant 0 : index
    %c0_155 = arith.constant 0 : index
    %339 = vector.load %arg6[%c0_154, %c0_155] : memref<128x16xbf16, #tpu.memory_space<vmem>>, vector<128x16xbf16>
    %cst_156 = arith.constant dense<0.000000e+00> : vector<16x16xf32>
    %340 = tpu.matmul %338, %339, %cst_156 {dimension_numbers = #tpu.dot_dimension_numbers<[1], [0], [0], [1], [0, 0, 1, 1], [], []>} : vector<16x128xbf16>, vector<128x16xbf16>, vector<16x16xf32> -> vector<16x16xf32>
    %c0_157 = arith.constant 0 : index
    %c0_158 = arith.constant 0 : index
    %341 = vector.load %arg7[%c0_157, %c0_158] : memref<1x16xf32, #tpu.memory_space<vmem>>, vector<1x16xf32>
    %342 = vector.broadcast %341 : vector<1x16xf32> to vector<16x16xf32>
    %343 = arith.addf %340, %342 : vector<16x16xf32>
    %344 = vector.extract_strided_slice %343 {offsets = [0, 0], sizes = [2, 16], strides = [1, 1]} : vector<16x16xf32> to vector<2x16xf32>
    %c0_159 = arith.constant 0 : index
    %c0_160 = arith.constant 0 : index
    %c0_161 = arith.constant 0 : index
    %345 = vector.load %arg8[%c0_159, %c0_160, %c0_161] : memref<8x2x16xf32, #tpu.memory_space<vmem>>, vector<1x2x16xf32>
    %346 = vector.shape_cast %345 : vector<1x2x16xf32> to vector<2x16xf32>
    %347 = vector.shape_cast %344 : vector<2x16xf32> to vector<1x2x16xf32>
    tpu.vector_store %arg8[%c0_159, %c0_160, %c0_161], %347 {strides = array<i32>} : memref<8x2x16xf32, #tpu.memory_space<vmem>>, vector<1x2x16xf32>,
    %348 = vector.extract_strided_slice %343 {offsets = [2, 0], sizes = [2, 16], strides = [1, 1]} : vector<16x16xf32> to vector<2x16xf32>
    %c1_162 = arith.constant 1 : index
    %c0_163 = arith.constant 0 : index
    %c0_164 = arith.constant 0 : index
    %349 = vector.load %arg8[%c1_162, %c0_163, %c0_164] : memref<8x2x16xf32, #tpu.memory_space<vmem>>, vector<1x2x16xf32>
    %350 = vector.shape_cast %349 : vector<1x2x16xf32> to vector<2x16xf32>
    %351 = vector.shape_cast %348 : vector<2x16xf32> to vector<1x2x16xf32>
    tpu.vector_store %arg8[%c1_162, %c0_163, %c0_164], %351 {strides = array<i32>} : memref<8x2x16xf32, #tpu.memory_space<vmem>>, vector<1x2x16xf32>,
    %352 = vector.extract_strided_slice %343 {offsets = [4, 0], sizes = [2, 16], strides = [1, 1]} : vector<16x16xf32> to vector<2x16xf32>
    %c2_165 = arith.constant 2 : index
    %c0_166 = arith.constant 0 : index
    %c0_167 = arith.constant 0 : index
    %353 = vector.load %arg8[%c2_165, %c0_166, %c0_167] : memref<8x2x16xf32, #tpu.memory_space<vmem>>, vector<1x2x16xf32>
    %354 = vector.shape_cast %353 : vector<1x2x16xf32> to vector<2x16xf32>
    %355 = vector.shape_cast %352 : vector<2x16xf32> to vector<1x2x16xf32>
    tpu.vector_store %arg8[%c2_165, %c0_166, %c0_167], %355 {strides = array<i32>} : memref<8x2x16xf32, #tpu.memory_space<vmem>>, vector<1x2x16xf32>,
    %356 = vector.extract_strided_slice %343 {offsets = [6, 0], sizes = [2, 16], strides = [1, 1]} : vector<16x16xf32> to vector<2x16xf32>
    %c3_168 = arith.constant 3 : index
    %c0_169 = arith.constant 0 : index
    %c0_170 = arith.constant 0 : index
    %357 = vector.load %arg8[%c3_168, %c0_169, %c0_170] : memref<8x2x16xf32, #tpu.memory_space<vmem>>, vector<1x2x16xf32>
    %358 = vector.shape_cast %357 : vector<1x2x16xf32> to vector<2x16xf32>
    %359 = vector.shape_cast %356 : vector<2x16xf32> to vector<1x2x16xf32>
    tpu.vector_store %arg8[%c3_168, %c0_169, %c0_170], %359 {strides = array<i32>} : memref<8x2x16xf32, #tpu.memory_space<vmem>>, vector<1x2x16xf32>,
    %360 = vector.extract_strided_slice %343 {offsets = [8, 0], sizes = [2, 16], strides = [1, 1]} : vector<16x16xf32> to vector<2x16xf32>
    %c4_171 = arith.constant 4 : index
    %c0_172 = arith.constant 0 : index
    %c0_173 = arith.constant 0 : index
    %361 = vector.load %arg8[%c4_171, %c0_172, %c0_173] : memref<8x2x16xf32, #tpu.memory_space<vmem>>, vector<1x2x16xf32>
    %362 = vector.shape_cast %361 : vector<1x2x16xf32> to vector<2x16xf32>
    %363 = vector.shape_cast %360 : vector<2x16xf32> to vector<1x2x16xf32>
    tpu.vector_store %arg8[%c4_171, %c0_172, %c0_173], %363 {strides = array<i32>} : memref<8x2x16xf32, #tpu.memory_space<vmem>>, vector<1x2x16xf32>,
    %364 = vector.extract_strided_slice %343 {offsets = [10, 0], sizes = [2, 16], strides = [1, 1]} : vector<16x16xf32> to vector<2x16xf32>
    %c5_174 = arith.constant 5 : index
    %c0_175 = arith.constant 0 : index
    %c0_176 = arith.constant 0 : index
    %365 = vector.load %arg8[%c5_174, %c0_175, %c0_176] : memref<8x2x16xf32, #tpu.memory_space<vmem>>, vector<1x2x16xf32>
    %366 = vector.shape_cast %365 : vector<1x2x16xf32> to vector<2x16xf32>
    %367 = vector.shape_cast %364 : vector<2x16xf32> to vector<1x2x16xf32>
    tpu.vector_store %arg8[%c5_174, %c0_175, %c0_176], %367 {strides = array<i32>} : memref<8x2x16xf32, #tpu.memory_space<vmem>>, vector<1x2x16xf32>,
    %368 = vector.extract_strided_slice %343 {offsets = [12, 0], sizes = [2, 16], strides = [1, 1]} : vector<16x16xf32> to vector<2x16xf32>
    %c6_177 = arith.constant 6 : index
    %c0_178 = arith.constant 0 : index
    %c0_179 = arith.constant 0 : index
    %369 = vector.load %arg8[%c6_177, %c0_178, %c0_179] : memref<8x2x16xf32, #tpu.memory_space<vmem>>, vector<1x2x16xf32>
    %370 = vector.shape_cast %369 : vector<1x2x16xf32> to vector<2x16xf32>
    %371 = vector.shape_cast %368 : vector<2x16xf32> to vector<1x2x16xf32>
    tpu.vector_store %arg8[%c6_177, %c0_178, %c0_179], %371 {strides = array<i32>} : memref<8x2x16xf32, #tpu.memory_space<vmem>>, vector<1x2x16xf32>,
    %372 = vector.extract_strided_slice %343 {offsets = [14, 0], sizes = [2, 16], strides = [1, 1]} : vector<16x16xf32> to vector<2x16xf32>
    %c7_180 = arith.constant 7 : index
    %c0_181 = arith.constant 0 : index
    %c0_182 = arith.constant 0 : index
    %373 = vector.load %arg8[%c7_180, %c0_181, %c0_182] : memref<8x2x16xf32, #tpu.memory_space<vmem>>, vector<1x2x16xf32>
    %374 = vector.shape_cast %373 : vector<1x2x16xf32> to vector<2x16xf32>
    %375 = vector.shape_cast %372 : vector<2x16xf32> to vector<1x2x16xf32>
    tpu.vector_store %arg8[%c7_180, %c0_181, %c0_182], %375 {strides = array<i32>} : memref<8x2x16xf32, #tpu.memory_space<vmem>>, vector<1x2x16xf32>,
    %c0_183 = arith.constant 0 : index
    %c0_184 = arith.constant 0 : index
    %c0_185 = arith.constant 0 : index
    %376 = vector.load %arg8[%c0_183, %c0_184, %c0_185] : memref<8x2x16xf32, #tpu.memory_space<vmem>>, vector<8x2x16xf32>
    %cst_186 = arith.constant dense<0xFF800000> : vector<2x16xf32>
    %377 = vector.multi_reduction <maximumf>, %376, %cst_186 [0] : vector<8x2x16xf32> to vector<2x16xf32>
    %378 = vector.shape_cast %377 : vector<2x16xf32> to vector<1x2x16xf32>
    %379 = vector.broadcast %378 : vector<1x2x16xf32> to vector<8x2x16xf32>
    %380 = arith.subf %376, %379 : vector<8x2x16xf32>
    %381 = math.exp %380 : vector<8x2x16xf32>
    %cst_187 = arith.constant dense<0.000000e+00> : vector<2x16xf32>
    %382 = vector.multi_reduction <add>, %381, %cst_187 [0] : vector<8x2x16xf32> to vector<2x16xf32>
    %383 = vector.shape_cast %382 : vector<2x16xf32> to vector<1x2x16xf32>
    %384 = math.log %383 : vector<1x2x16xf32>
    %385 = arith.addf %384, %378 : vector<1x2x16xf32>
    %386 = vector.broadcast %385 : vector<1x2x16xf32> to vector<8x2x16xf32>
    %387 = arith.subf %376, %386 : vector<8x2x16xf32>
    %c0_188 = arith.constant 0 : index
    %c0_189 = arith.constant 0 : index
    %c0_190 = arith.constant 0 : index
    %388 = vector.load %arg8[%c0_188, %c0_189, %c0_190] : memref<8x2x16xf32, #tpu.memory_space<vmem>>, vector<8x2x16xf32>
    tpu.vector_store %arg8[%c0_188, %c0_189, %c0_190], %387 {strides = array<i32>} : memref<8x2x16xf32, #tpu.memory_space<vmem>>, vector<8x2x16xf32>,
    return
  }
  func.func @transform_0(%arg0: i32, %arg1: memref<2x8xi32, #tpu.memory_space<smem>>) -> (i32, i32, i32) {
    %c0_i32 = arith.constant 0 : i32
    %c0_i32_0 = arith.constant 0 : i32
    %c0_i32_1 = arith.constant 0 : i32
    %c0_i32_2 = arith.constant 0 : i32
    return %c0_i32, %c0_i32_0, %c0_i32_1 : i32, i32, i32
  }
  func.func @transform_1(%arg0: i32, %arg1: memref<2x8xi32, #tpu.memory_space<smem>>) -> (i32, i32) {
    %c0_i32 = arith.constant 0 : i32
    %c0_i32_0 = arith.constant 0 : i32
    %c0_i32_1 = arith.constant 0 : i32
    return %c0_i32, %c0_i32_0 : i32, i32
  }
  func.func @transform_2(%arg0: i32, %arg1: memref<2x8xi32, #tpu.memory_space<smem>>) -> (i32, i32) {
    %c0_i32 = arith.constant 0 : i32
    %c0_i32_0 = arith.constant 0 : i32
    %c0_i32_1 = arith.constant 0 : i32
    return %c0_i32, %c0_i32_0 : i32, i32
  }
  func.func @transform_3(%arg0: i32, %arg1: memref<2x8xi32, #tpu.memory_space<smem>>) -> (i32, i32) {
    %c0_i32 = arith.constant 0 : i32
    %c0_i32_0 = arith.constant 0 : i32
    %c0_i32_1 = arith.constant 0 : i32
    return %c0_i32, %c0_i32_0 : i32, i32
  }
  func.func @transform_4(%arg0: i32, %arg1: memref<2x8xi32, #tpu.memory_space<smem>>) -> (i32, i32) {
    %c0_i32 = arith.constant 0 : i32
    %c0_i32_0 = arith.constant 0 : i32
    %c0_i32_1 = arith.constant 0 : i32
    return %c0_i32, %c0_i32_0 : i32, i32
  }
  func.func @transform_5(%arg0: i32, %arg1: memref<2x8xi32, #tpu.memory_space<smem>>) -> (i32, i32) {
    %c0_i32 = arith.constant 0 : i32
    %c0_i32_0 = arith.constant 0 : i32
    %c0_i32_1 = arith.constant 0 : i32
    return %c0_i32, %c0_i32_0 : i32, i32
  }
  func.func @transform_6(%arg0: i32, %arg1: memref<2x8xi32, #tpu.memory_space<smem>>) -> (i32, i32, i32) {
    %c0_i32 = arith.constant 0 : i32
    %c0_i32_0 = arith.constant 0 : i32
    %c0_i32_1 = arith.constant 0 : i32
    %c0_i32_2 = arith.constant 0 : i32
    return %c0_i32, %c0_i32_0, %c0_i32_1 : i32, i32, i32
  }
}

</mosaic_0001>

<bundles_post_ra>
// kernel: lstm_tagger_forward.1
= control target key start
LH: loop header
LB: loop body
LE: loop exit
PB: predicated region body
PF: predicated region fallthrough
CT: control target
= control target key end

     0   :  { %s4802_s0 = inlined_call_operand.vmem [shape: s32[2,8], index: 0, kind: input, shape index: {}]   ;;  %s4803_s1 = inlined_call_operand.vmem [shape: f32[120,1,64], index: 1, kind: input, shape index: {}]   ;;  %s4804_s2 = inlined_call_operand.vmem [shape: bf16[64,512], index: 2, kind: input, shape index: {}]   ;;  %s4805_s3 = inlined_call_operand.vmem [shape: bf16[128,512], index: 3, kind: input, shape index: {}]   ;;  %s4806_s4 = inlined_call_operand.vmem [shape: f32[1,512], index: 4, kind: input, shape index: {}]   ;;  %s4807_s5 = inlined_call_operand.vmem [shape: bf16[128,16], index: 5, kind: input, shape index: {}]   ;;  %s4808_s6 = inlined_call_operand.vmem [shape: f32[1,16], index: 6, kind: input, shape index: {}]   ;;  %s4809_s7 = inlined_call_operand.vmem [shape: f32[8,2,16], index: 7, kind: output, shape index: {}]  }
   0x1   :  { %s12_s26 = sshll.u32 %s4802_s0, 4  ;;  %s13_s26 = int_to_ptr.vmem [resolvable:$true] %s12_s26 }
   0x2   :  { %s3729_s27 = scalar_lea.vmem %s13_s26, 32  ;;  %p3734_p1 = scmp.lt.s32.totalorder %s13_s26, %s13_s26 }
   0x3   :  { %p3730_p0 = scmp.ne.s32.totalorder %s13_s26, %s3729_s27  ;;  %p3735_p2 = scmp.lt.s32.totalorder %s3729_s27, %s3729_s27 }
   0x5   :  { %p3736_p3 = por %p3735_p2, %p3734_p1 }
   0x7   :  { %p3737_p4 = pnand %p3736_p3, %p3730_p0 }
   0x9   :  { %3740 = shalt.err (!%p3737_p4)  }
   0xa   :  { %s3743_s28 = smov [#allocation5]  }
   0xb   :  { %15 = dma.vmem_to_smem %s13_s26, 32, %s3743_s28, [#allocation4] }
   0xc   :  { %3741 = dma.done.wait [#allocation4], 32 }
   0xd   :  { %3742 = vsyncadd [#allocation4], 4294967264 }
   0xe   :  { %17 = sfence }
   0xf   :  { %v3443_v0 = vld [vmem:[%s4804_s2 + $0x4] ss:$16 sps:$4 sm:$0xff]   ;;  %v3744_v2 = vmov 0   ;;  %s3799_s0 = sld [smem:[#allocation5]]  ;;  %v3447_v3 = vld [vmem:[%s4804_s2] ss:$16 sps:$4 sm:$0xff]  }
  0x10   :  { %v3796_v1 = vld [vmem:[%s4805_s3 + $0x4] ss:$16 sps:$4 sm:$0xff]   ;;  %253 = vmatprep.mubr.bf16.mxu1 %v3744_v2  ;;  %531 = vmatprep.mubr.bf16.mxu0 %v3744_v2  ;;  %v3808_v4 = vld [vmem:[%s4805_s3] ss:$16 sps:$4 sm:$0xff]   ;;  %s3081_s16 = sld [smem:[#allocation5 + $0x80]]  ;;  %vm34_vm0 = vcmask 516096  }
  0x11   :  { %221 = vmatprep.subr.bf16.mxu1 %v3443_v0  ;;  %499 = vmatprep.subr.bf16.mxu0 %v3796_v1  ;;  %v3449_v5 = vld [vmem:[%s4804_s2 + $0x24] ss:$16 sps:$4 sm:$0xff]   ;;  %v3453_v7 = vld [vmem:[%s4804_s2 + $0x20] ss:$16 sps:$4 sm:$0xff]   ;;  %s3082_s23 = sld [smem:[#allocation5 + $0x1]]  ;;  %s3855_s15 = sld [smem:[#allocation5 + $0x2]] }
  0x12   :  { %222 = vmatpush1.bf16.msra.mxu1 %v3447_v3  ;;  %500 = vmatpush1.bf16.msra.mxu0 %v3808_v4  ;;  %v3818_v6 = vld [vmem:[%s4805_s3 + $0x24] ss:$16 sps:$4 sm:$0xff]   ;;  %v3826_v8 = vld [vmem:[%s4805_s3 + $0x20] ss:$16 sps:$4 sm:$0xff]   ;;  %s3832_s26 = sld [smem:[#allocation5 + $0x81]]  ;;  %s3866_s21 = sld [smem:[#allocation5 + $0x82]] }
  0x13   :  { %223 = vmatprep.subr.bf16.mxu1 %v3449_v5  ;;  %501 = vmatprep.subr.bf16.mxu0 %v3818_v6  ;;  %v3455_v9 = vld [vmem:[%s4804_s2 + $0x44] ss:$16 sps:$4 sm:$0xff]   ;;  %v3459_v11 = vld [vmem:[%s4804_s2 + $0x40] ss:$16 sps:$4 sm:$0xff]   ;;  %s3875_s29 = sld [smem:[#allocation5 + $0x3]]  ;;  %s3892_s11 = sld [smem:[#allocation5 + $0x4]] }
  0x14   :  { %v3837_v10 = vld [vmem:[%s4805_s3 + $0x44] ss:$16 sps:$4 sm:$0xff]   ;;  %v3845_v12 = vld [vmem:[%s4805_s3 + $0x40] ss:$16 sps:$4 sm:$0xff]   ;;  %v3469_v21 = vld [vmem:[%s4804_s2 + $0xc] ss:$16 sps:$4 sm:$0xff]  }
  0x15   :  { %s32_s12 = scalar_lea.vmem %s4803_s1, %s3799_s0  ;;  %v3461_v13 = vld [vmem:[%s4804_s2 + $0x64] ss:$16 sps:$4 sm:$0xff]   ;;  %v3465_v15 = vld [vmem:[%s4804_s2 + $0x60] ss:$16 sps:$4 sm:$0xff]   ;;  %s3910_s24 = sld [smem:[#allocation5 + $0x85]]  ;;  %vm217_vm1 = vcmask 523264  }
  0x16   :  { %224 = vmatpush1.bf16.msra.mxu1 %v3453_v7  ;;  %502 = vmatpush1.bf16.msra.mxu0 %v3826_v8  ;;  %v3861_v14 = vld [vmem:[%s4805_s3 + $0x64] ss:$16 sps:$4 sm:$0xff]   ;;  %s37_s20 = scalar_lea.vmem %s4803_s1, %s3081_s16  ;;  %v33_v16 = vld [vmem:[%s32_s12] sm:$0x1]  ;;  %s3894_s12 = sld [smem:[#allocation5 + $0x84]]  ;;  %v117_v7 = vlaneseq  ;;  %vm3746_vm2 = vmmov 0  }
  0x17   :  { %225 = vmatprep.subr.bf16.mxu1 %v3455_v9  ;;  %503 = vmatprep.subr.bf16.mxu0 %v3837_v10  ;;  %35 = vst.msk [vmem:[#allocation2] sm:$0x1] %vm34_vm0, %v33_v16  ;;  %v38_v17 = vld [vmem:[%s37_s20] sm:$0x1]  ;;  %s41_s28 = scalar_lea.vmem %s4803_s1, %s3082_s23  ;;  %s3888_s23 = sld [smem:[#allocation5 + $0x83]]  ;;  %vm2961_vm3 = vcmask 123904  }
  0x18   :  { %v3881_v18 = vld [vmem:[%s4805_s3 + $0x60] ss:$16 sps:$4 sm:$0xff]   ;;  %39 = vst.msk [vmem:[#allocation2 + $0x1] sm:$0x1] %vm34_vm0, %v38_v17  ;;  %s45_s10 = scalar_lea.vmem %s4803_s1, %s3832_s26  ;;  %s49_s17 = scalar_lea.vmem %s4803_s1, %s3855_s15  ;;  %v3915_v23 = vld [vmem:[%s4805_s3 + $0x84] ss:$16 sps:$4 sm:$0xff]  }
  0x19   :  { %v42_v19 = vld [vmem:[%s41_s28] sm:$0x1]  ;;  %s3901_s26 = sld [smem:[#allocation5 + $0x5]]  ;;  %s53_s22 = scalar_lea.vmem %s4803_s1, %s3866_s21  ;;  %v3966_v31 = vld [vmem:[%s4805_s3 + $0xa4] ss:$16 sps:$4 sm:$0xff]   ;;  %v118_v9 = vshrl.u32 %v117_v7, 7 }
  0x1a   :  { %226 = vmatpush1.bf16.msra.mxu1 %v3459_v11  ;;  %504 = vmatpush1.bf16.msra.mxu0 %v3845_v12  ;;  %43 = vst.msk [vmem:[#allocation2 + $0x2] sm:$0x1] %vm34_vm0, %v42_v19  ;;  %v46_v20 = vld [vmem:[%s45_s10] sm:$0x1]  ;;  %s3919_s15 = sld [smem:[#allocation5 + $0x6]]  ;;  %s57_s30 = scalar_lea.vmem %s4803_s1, %s3875_s29  ;;  %vm2964_vm4 = vcmask 125954  }
  0x1b   :  { %227 = vmatprep.subr.bf16.mxu1 %v3461_v13  ;;  %505 = vmatprep.subr.bf16.mxu0 %v3861_v14  ;;  %47 = vst.msk [vmem:[#allocation2 + $0x3] sm:$0x1] %vm34_vm0, %v46_v20  ;;  %v50_v22 = vld [vmem:[%s49_s17] sm:$0x1]  ;;  %s3921_s28 = sld [smem:[#allocation5 + $0x86]]  ;;  %s3928_s8 = sld [smem:[#allocation5 + $0x7]] }
  0x1c   :  { %51 = vst.msk [vmem:[#allocation2 + $0x4] sm:$0x1] %vm34_vm0, %v50_v22  ;;  %v54_v24 = vld [vmem:[%s53_s22] sm:$0x1]  ;;  %s3940_s18 = sld [smem:[#allocation5 + $0x87]]  ;;  %s65_s0 = scalar_lea.vmem %s4803_s1, %s3892_s11  ;;  %v119_v11 = vsub.s32 0, %v118_v9 }
  0x1d   :  { %55 = vst.msk [vmem:[#allocation2 + $0x5] sm:$0x1] %vm34_vm0, %v54_v24  ;;  %v3934_v25 = vld [vmem:[%s4805_s3 + $0x80] ss:$16 sps:$4 sm:$0xff]   ;;  %s61_s17 = scalar_lea.vmem %s4803_s1, %s3888_s23  ;;  %s69_s25 = scalar_lea.vmem %s4803_s1, %s3894_s12  ;;  %v3999_v38 = vld [vmem:[%s4805_s3 + $0xc4] ss:$16 sps:$4 sm:$0xff]  }
  0x1e   :  { %228 = vmatpush1.bf16.msra.mxu1 %v3465_v15  ;;  %506 = vmatpush1.bf16.msra.mxu0 %v3881_v18  ;;  %v58_v26 = vld [vmem:[%s57_s30] sm:$0x1]  ;;  %s77_s12 = scalar_lea.vmem %s4803_s1, %s3910_s24  ;;  %v4012_v40 = vld [vmem:[%s4805_s3 + $0xe4] ss:$16 sps:$4 sm:$0xff]   ;;  %v3467_v44 = vld [vmem:[%s4804_s2 + $0x8] ss:$16 sps:$4 sm:$0xff]  }
  0x1f   :  { %264 = vmatprep.subr.bf16.mxu1 %v3469_v21  ;;  %507 = vmatprep.subr.bf16.mxu0 %v3915_v23  ;;  %59 = vst.msk [vmem:[#allocation2 + $0x6] sm:$0x1] %vm34_vm0, %v58_v26  ;;  %v62_v27 = vld [vmem:[%s61_s17] sm:$0x1]  ;;  %s73_s21 = scalar_lea.vmem %s4803_s1, %s3901_s26  ;;  %v3475_v46 = vld [vmem:[%s4804_s2 + $0x2c] ss:$16 sps:$4 sm:$0xff]  }
  0x20   :  { %63 = vst.msk [vmem:[#allocation2 + $0x7] sm:$0x1] %vm34_vm0, %v62_v27  ;;  %v66_v28 = vld [vmem:[%s65_s0] sm:$0x1]  ;;  %s81_s17 = scalar_lea.vmem %s4803_s1, %s3919_s15  ;;  %v3473_v47 = vld [vmem:[%s4804_s2 + $0x28] ss:$16 sps:$4 sm:$0xff]  }
  0x21   :  { %v70_v29 = vld [vmem:[%s69_s25] sm:$0x1]  ;;  %67 = vst.msk [vmem:[#allocation2 + $0x8] sm:$0x1] %vm34_vm0, %v66_v28  ;;  %s85_s24 = scalar_lea.vmem %s4803_s1, %s3921_s28  ;;  %s89_s22 = scalar_lea.vmem %s4803_s1, %s3928_s8  ;;  %v3481_v48 = vld [vmem:[%s4804_s2 + $0x4c] ss:$16 sps:$4 sm:$0xff]  }
  0x22   :  { %508 = vmatpush1.bf16.msra.mxu0 %v3934_v25  ;;  %71 = vst.msk [vmem:[#allocation2 + $0x9] sm:$0x1] %vm34_vm0, %v70_v29  ;;  %v74_v30 = vld [vmem:[%s73_s21] sm:$0x1]  ;;  %s93_s23 = scalar_lea.vmem %s4803_s1, %s3940_s18  ;;  %v3479_v49 = vld [vmem:[%s4804_s2 + $0x48] ss:$16 sps:$4 sm:$0xff]  }
  0x23   :  { %v3971_v32 = vld [vmem:[%s4805_s3 + $0xa0] ss:$16 sps:$4 sm:$0xff]   ;;  %75 = vst.msk [vmem:[#allocation2 + $0xa] sm:$0x1] %vm34_vm0, %v74_v30  ;;  %509 = vmatprep.subr.bf16.mxu0 %v3966_v31  ;;  %v3487_v50 = vld [vmem:[%s4804_s2 + $0x6c] ss:$16 sps:$4 sm:$0xff]  }
  0x24   :  { %v78_v33 = vld [vmem:[%s77_s12] sm:$0x1]  ;;  %v3485_v51 = vld [vmem:[%s4804_s2 + $0x68] ss:$16 sps:$4 sm:$0xff]   ;;  %v4054_v52 = vld [vmem:[%s4805_s3 + $0xc] ss:$16 sps:$4 sm:$0xff]  }
  0x25   :  { %79 = vst.msk [vmem:[#allocation2 + $0xb] sm:$0x1] %vm34_vm0, %v78_v33  ;;  %v82_v34 = vld [vmem:[%s81_s17] sm:$0x1]  ;;  %v4061_v53 = vld [vmem:[%s4805_s3 + $0x8] ss:$16 sps:$4 sm:$0xff]  }
  0x26   :  { %v86_v35 = vld [vmem:[%s85_s24] sm:$0x1]  ;;  %83 = vst.msk [vmem:[#allocation2 + $0xc] sm:$0x1] %vm34_vm0, %v82_v34  ;;  %510 = vmatpush1.bf16.msra.mxu0 %v3971_v32  ;;  %v4066_v54 = vld [vmem:[%s4805_s3 + $0x2c] ss:$16 sps:$4 sm:$0xff]  }
  0x27   :  { %87 = vst.msk [vmem:[#allocation2 + $0xd] sm:$0x1] %vm34_vm0, %v86_v35  ;;  %v90_v36 = vld [vmem:[%s89_s22] sm:$0x1]  ;;  %511 = vmatprep.subr.bf16.mxu0 %v3999_v38  ;;  %v4074_v55 = vld [vmem:[%s4805_s3 + $0x28] ss:$16 sps:$4 sm:$0xff]  }
  0x28   :  { %91 = vst.msk [vmem:[#allocation2 + $0xe] sm:$0x1] %vm34_vm0, %v90_v36  ;;  %v94_v37 = vld [vmem:[%s93_s23] sm:$0x1]  ;;  %v4080_v56 = vld [vmem:[%s4805_s3 + $0x4c] ss:$16 sps:$4 sm:$0xff]  }
  0x29   :  { %95 = vst.msk [vmem:[#allocation2 + $0xf] sm:$0x1] %vm34_vm0, %v94_v37  ;;  %v4005_v39 = vld [vmem:[%s4805_s3 + $0xc0] ss:$16 sps:$4 sm:$0xff]   ;;  %v4090_v57 = vld [vmem:[%s4805_s3 + $0x48] ss:$16 sps:$4 sm:$0xff]  }
  0x2a   :  { %512 = vmatpush1.bf16.msra.mxu0 %v4005_v39  ;;  %v4017_v41 = vld [vmem:[%s4805_s3 + $0xe0] ss:$16 sps:$4 sm:$0xff]   ;;  %v4095_v58 = vld [vmem:[%s4805_s3 + $0x6c] ss:$16 sps:$4 sm:$0xff]   ;;  %v4106_v59 = vld [vmem:[%s4805_s3 + $0x68] ss:$16 sps:$4 sm:$0xff]  }
  0x2b   :  { %513 = vmatprep.subr.bf16.mxu0 %v4012_v40  ;;  %v96_v42 = vld [vmem:[#allocation2] sm:$0xff]  ;;  %v4113_v60 = vld [vmem:[%s4805_s3 + $0x8c] ss:$16 sps:$4 sm:$0xff]   ;;  %v4120_v61 = vld [vmem:[%s4805_s3 + $0x88] ss:$16 sps:$4 sm:$0xff]   ;;  %v123_v15 = vsub.s32 1, %v118_v9 }
  0x2c   :  { %v4127_v62 = vld [vmem:[%s4805_s3 + $0xac] ss:$16 sps:$4 sm:$0xff]   ;;  %v4133_v63 = vld [vmem:[%s4805_s3 + $0xa8] ss:$16 sps:$4 sm:$0xff]   ;;  %v115_v13 = vld [vmem:[%s4806_s4] sm:$0xf] }
  0x2d   :  { %v4139_v0 = vld [vmem:[%s4805_s3 + $0xcc] ss:$16 sps:$4 sm:$0xff]   ;;  %v4157_v5 = vld [vmem:[%s4805_s3 + $0xe8] ss:$16 sps:$4 sm:$0xff]   ;;  %v120_v16 = vrot.slane %v115_v13, %v119_v11  ;;  %v124_v24 = vrot.slane %v115_v13, %v123_v15  ;;  %v127_v33 = vsub.s32 2, %v118_v9  ;;  %v131_v34 = vsub.s32 3, %v118_v9 }
  0x2e   :  { %514 = vmatpush1.bf16.msra.mxu0 %v4017_v41  ;;  %v4151_v3 = vld [vmem:[%s4805_s3 + $0xec] ss:$16 sps:$4 sm:$0xff]   ;;  %vm2967_vm5 = vcmask 128004   ;;  %vm2970_vm6 = vcmask 130054  }
  0x2f   :  { %803 = vmatprep.subr.bf16.mxu0 %v3796_v1  ;;  %v128_v35 = vrot.slane %v115_v13, %v127_v33 }
  0x30   :  { %v97_v43 = vld [vmem:[#allocation2 + $0x8] sm:$0xff] }
  0x31   :  { %v98_v45 = vpack.c.bf16 %v97_v43, %v96_v42  ;;  %532 = vmatmul.mubr.bf16.vlgmr.msra.gmra.mrb[0].mxu0 %v3744_v2  ;;  %v132_v42 = vrot.slane %v115_v13, %v131_v34 }
  0x32   :  { %804 = vmatpush1.bf16.msra.mxu0 %v3808_v4  ;;  %835 = vmatprep.mubr.bf16.mxu0 %v3744_v2 }
  0x33   :  { %3112 = vmatmul.mubr.msk.bf16.vlgmr.msra.gmra.mrb[0].mxu1 %vm217_vm1, %v98_v45  ;;  %805 = vmatprep.subr.bf16.mxu0 %v3818_v6 }
  0x34   :  { %265 = vmatpush1.bf16.msra.mxu1 %v3467_v44  ;;  %296 = vmatprep.mubr.bf16.mxu1 %v3744_v2 }
  0x35   :  { %266 = vmatprep.subr.bf16.mxu1 %v3475_v46 }
  0x36   :  { %806 = vmatpush1.bf16.msra.mxu0 %v3826_v8 }
  0x37   :  { %807 = vmatprep.subr.bf16.mxu0 %v3837_v10 }
  0x38   :  { %267 = vmatpush1.bf16.msra.mxu1 %v3473_v47 }
  0x39   :  { %268 = vmatprep.subr.bf16.mxu1 %v3481_v48 }
  0x3a   :  { %808 = vmatpush1.bf16.msra.mxu0 %v3845_v12 }
  0x3b   :  { %809 = vmatprep.subr.bf16.mxu0 %v3861_v14 }
  0x3c   :  { %269 = vmatpush1.bf16.msra.mxu1 %v3479_v49 }
  0x3d   :  { %270 = vmatprep.subr.bf16.mxu1 %v3487_v50 }
  0x3e   :  { %810 = vmatpush1.bf16.msra.mxu0 %v3881_v18 }
  0x3f   :  { %811 = vmatprep.subr.bf16.mxu0 %v3915_v23 }
  0x40   :  { %271 = vmatpush1.bf16.msra.mxu1 %v3485_v51 }
  0x41   :  { %540 = vmatprep.subr.bf16.mxu1 %v4054_v52 }
  0x42   :  { %812 = vmatpush1.bf16.msra.mxu0 %v3934_v25 }
  0x43   :  { %3113 = vmatmul.mubr.msk.bf16.vlgmr.msra.gmra.mrb[4].mxu1 %vm217_vm1, %v98_v45  ;;  %813 = vmatprep.subr.bf16.mxu0 %v3966_v31 }
  0x44   :  { %541 = vmatpush1.bf16.msra.mxu1 %v4061_v53  ;;  %572 = vmatprep.mubr.bf16.mxu1 %v3744_v2 }
  0x45   :  { %542 = vmatprep.subr.bf16.mxu1 %v4066_v54 }
  0x46   :  { %814 = vmatpush1.bf16.msra.mxu0 %v3971_v32 }
  0x47   :  { %815 = vmatprep.subr.bf16.mxu0 %v3999_v38 }
  0x48   :  { %543 = vmatpush1.bf16.msra.mxu1 %v4074_v55 }
  0x49   :  { %544 = vmatprep.subr.bf16.mxu1 %v4080_v56 }
  0x4a   :  { %816 = vmatpush1.bf16.msra.mxu0 %v4005_v39 }
  0x4b   :  { %817 = vmatprep.subr.bf16.mxu0 %v4012_v40 }
  0x4c   :  { %545 = vmatpush1.bf16.msra.mxu1 %v4090_v57 }
  0x4d   :  { %546 = vmatprep.subr.bf16.mxu1 %v4095_v58 }
  0x4e   :  { %818 = vmatpush1.bf16.msra.mxu0 %v4017_v41 }
  0x4f   :  { %1125 = vmatprep.subr.bf16.mxu0 %v3796_v1  ;;  %v4145_v1 = vld [vmem:[%s4805_s3 + $0xc8] ss:$16 sps:$4 sm:$0xff]  }
  0x50   :  { %547 = vmatpush1.bf16.msra.mxu1 %v4106_v59 }
  0x51   :  { %548 = vmatprep.subr.bf16.mxu1 %v4113_v60 }
  0x54   :  { %549 = vmatpush1.bf16.msra.mxu1 %v4120_v61 }
  0x55   :  { %550 = vmatprep.subr.bf16.mxu1 %v4127_v62 }
  0x58   :  { %551 = vmatpush1.bf16.msra.mxu1 %v4133_v63 }
  0x59   :  { %552 = vmatprep.subr.bf16.mxu1 %v4139_v0 }
  0x5c   :  { %553 = vmatpush1.bf16.msra.mxu1 %v4145_v1 }
  0x5d   :  { %554 = vmatprep.subr.bf16.mxu1 %v4151_v3 }
  0x60   :  { %555 = vmatpush1.bf16.msra.mxu1 %v4157_v5 }
  0x61   :  { %844 = vmatprep.subr.bf16.mxu1 %v4054_v52 }
  0x63   :  { %573 = vmatmul.mubr.bf16.vlgmr.msra.gmra.mrb[8].mxu1 %v3744_v2 }
  0x64   :  { %845 = vmatpush1.bf16.msra.mxu1 %v4061_v53  ;;  %876 = vmatprep.mubr.bf16.mxu1 %v3744_v2 }
  0x65   :  { %846 = vmatprep.subr.bf16.mxu1 %v4066_v54 }
  0x68   :  { %847 = vmatpush1.bf16.msra.mxu1 %v4074_v55 }
  0x69   :  { %848 = vmatprep.subr.bf16.mxu1 %v4080_v56 }
  0x6c   :  { %849 = vmatpush1.bf16.msra.mxu1 %v4090_v57 }
  0x6d   :  { %850 = vmatprep.subr.bf16.mxu1 %v4095_v58 }
  0x70   :  { %851 = vmatpush1.bf16.msra.mxu1 %v4106_v59 }
  0x71   :  { %852 = vmatprep.subr.bf16.mxu1 %v4113_v60 }
  0x74   :  { %853 = vmatpush1.bf16.msra.mxu1 %v4120_v61 }
  0x75   :  { %854 = vmatprep.subr.bf16.mxu1 %v4127_v62 }
  0x78   :  { %855 = vmatpush1.bf16.msra.mxu1 %v4133_v63 }
  0x79   :  { %856 = vmatprep.subr.bf16.mxu1 %v4139_v0 }
  0x7c   :  { %857 = vmatpush1.bf16.msra.mxu1 %v4145_v1 }
  0x7d   :  { %858 = vmatprep.subr.bf16.mxu1 %v4151_v3 }
  0x80   :  { %859 = vmatpush1.bf16.msra.mxu1 %v4157_v5 }
  0x81   :  { %1166 = vmatprep.subr.bf16.mxu1 %v4054_v52 }
 0x104   :  { %v533_v17 = vpop.f32.mrb[0].mxu0 }
 0x105   :  { %v535_v20 = vpop.f32.mrb[1].mxu0 }
 0x106   :  { %v255_v19 = vpop.f32.mrb[0].mxu1  ;;  %v537_v22 = vpop.f32.mrb[2].mxu0 }
 0x107   :  { %v257_v21 = vpop.f32.mrb[1].mxu1  ;;  %v538_v27 = vpop.f32.mrb[3].mxu0  ;;  %v4193_v48 = vadd.f32 %v255_v19, %v120_v16 }
 0x108   :  { %v259_v26 = vpop.f32.mrb[2].mxu1  ;;  %v4191_v47 = vadd.f32 %v257_v21, %v124_v24 }
 0x109   :  { %v4183_v28 = vadd.f32 %v259_v26, %v120_v16  ;;  %v261_v29 = vpop.f32.mrb[3].mxu1  ;;  %v581_v50 = vadd.f32 %v533_v17, %v4193_v48 }
 0x10a   :  { %v4185_v30 = vadd.f32 %v261_v29, %v124_v24  ;;  %v582_v49 = vadd.f32 %v535_v20, %v4191_v47 }
 0x10b   :  { %v3146_v7 = vmul.f32 -1.442695, %v581_v50 }
 0x10c   :  { %v3147_v51 = vmul.f32 -1.442695, %v582_v49 }
 0x10e   :  { %3583 = vpow2.f32 %v3147_v51 }
 0x10f   :  { %3585 = vpow2.f32 %v3146_v7 }
 0x116   :  { %v298_v36 = vpop.f32.mrb[4].mxu1 }
 0x117   :  { %v300_v37 = vpop.f32.mrb[5].mxu1  ;;  %v4197_v22 = vadd.f32 %v298_v36, %v128_v35 }
 0x118   :  { %v302_v43 = vpop.f32.mrb[6].mxu1  ;;  %v3584_v9 = vpop.eup %3583  ;;  %v4199_v26 = vadd.f32 %v300_v37, %v132_v42 }
 0x119   :  { %v4187_v44 = vadd.f32 %v302_v43, %v128_v35  ;;  %v304_v45 = vpop.f32.mrb[7].mxu1  ;;  %v3586_v11 = vpop.eup %3585  ;;  %v594_v13 = vadd.f32 1.0, %v3584_v9 }
 0x11a   :  { %v4189_v46 = vadd.f32 %v304_v45, %v132_v42  ;;  %v588_v15 = vadd.f32 1.0, %v3586_v11 }
 0x11b   :  { %3587 = vrcp.f32 %v594_v13 }
 0x11c   :  { %3589 = vrcp.f32 %v588_v15 }
 0x125   :  { %v3588_v29 = vpop.eup %3587 }
 0x126   :  { %v3590_v33 = vpop.eup %3589  ;;  %v604_v35 = vmul.f32 0.0, %v3588_v29 }
 0x136   :  { %v574_v21 = vpop.f32.mrb[8].mxu1 }
 0x137   :  { %v583_v16 = vadd.f32 %v574_v21, %v4197_v22  ;;  %v576_v19 = vpop.f32.mrb[9].mxu1 }
 0x138   :  { %v584_v17 = vadd.f32 %v576_v19, %v4199_v26  ;;  %v578_v20 = vpop.f32.mrb[10].mxu1 }
 0x139   :  { %3591 = vtanh.f32 %v583_v16  ;;  %v579_v24 = vpop.f32.mrb[11].mxu1 }
 0x13a   :  { %v3148_v27 = vmul.f32 -1.442695, %v584_v17 }
 0x13c   :  { %3593 = vpow2.f32 %v3148_v27 }
 0x143   :  { %v3592_v34 = vpop.eup %3591 }
 0x144   :  { %v605_v36 = vmul.f32 %v3592_v34, %v3590_v33 }
 0x146   :  { %v3594_v37 = vpop.eup %3593  ;;  %v4203_v42 = vadd.f32 %v605_v36, %v604_v35 }
 0x147   :  { %v601_v43 = vadd.f32 1.0, %v3594_v37 }
 0x148   :  { %3595 = vtanh.f32 %v4203_v42 }
 0x149   :  { %3597 = vrcp.f32 %v601_v43  ;;  %v921_v43 = vrot.slane %v4203_v42, 6 }
 0x152   :  { %v3596_v45 = vpop.eup %3595 }
 0x153   :  { %v3598_v49 = vpop.eup %3597 }
 0x154   :  { %v608_v50 = vmul.f32 %v3598_v49, %v3596_v45 }
 0x156   :  { %609 = vst [vmem:[#allocation3] sm:$0x3] %v608_v50  ;;  %v610_v51 = vpack.c.bf16 %v608_v50, %v608_v50 }
 0x158   :  { %836 = vmatmul.mubr.bf16.vlgmr.msra.gmra.mrb[4].mxu0 %v610_v51  ;;  %877 = vmatmul.mubr.bf16.vlgmr.msra.gmra.mrb[12].mxu1 %v610_v51 }
 0x159   :  { %1126 = vmatpush1.bf16.msra.mxu0 %v3808_v4  ;;  %1167 = vmatpush1.bf16.msra.mxu1 %v4061_v53 }
 0x15a   :  { %1127 = vmatprep.subr.bf16.mxu0 %v3818_v6  ;;  %1168 = vmatprep.subr.bf16.mxu1 %v4066_v54 }
 0x15b   :  { %1157 = vmatprep.mubr.bf16.mxu0 %v3744_v2  ;;  %1198 = vmatprep.mubr.bf16.mxu1 %v3744_v2 }
 0x15d   :  { %1128 = vmatpush1.bf16.msra.mxu0 %v3826_v8  ;;  %1169 = vmatpush1.bf16.msra.mxu1 %v4074_v55 }
 0x15e   :  { %1129 = vmatprep.subr.bf16.mxu0 %v3837_v10  ;;  %1170 = vmatprep.subr.bf16.mxu1 %v4080_v56 }
 0x161   :  { %1130 = vmatpush1.bf16.msra.mxu0 %v3845_v12  ;;  %1171 = vmatpush1.bf16.msra.mxu1 %v4090_v57 }
 0x162   :  { %1131 = vmatprep.subr.bf16.mxu0 %v3861_v14  ;;  %1172 = vmatprep.subr.bf16.mxu1 %v4095_v58 }
 0x165   :  { %1132 = vmatpush1.bf16.msra.mxu0 %v3881_v18  ;;  %1173 = vmatpush1.bf16.msra.mxu1 %v4106_v59 }
 0x166   :  { %1133 = vmatprep.subr.bf16.mxu0 %v3915_v23  ;;  %1174 = vmatprep.subr.bf16.mxu1 %v4113_v60 }
 0x169   :  { %1134 = vmatpush1.bf16.msra.mxu0 %v3934_v25  ;;  %1175 = vmatpush1.bf16.msra.mxu1 %v4120_v61 }
 0x16a   :  { %1135 = vmatprep.subr.bf16.mxu0 %v3966_v31  ;;  %1176 = vmatprep.subr.bf16.mxu1 %v4127_v62 }
 0x16d   :  { %1136 = vmatpush1.bf16.msra.mxu0 %v3971_v32  ;;  %1177 = vmatpush1.bf16.msra.mxu1 %v4133_v63 }
 0x16e   :  { %1137 = vmatprep.subr.bf16.mxu0 %v3999_v38  ;;  %1178 = vmatprep.subr.bf16.mxu1 %v4139_v0 }
 0x171   :  { %1138 = vmatpush1.bf16.msra.mxu0 %v4005_v39  ;;  %1179 = vmatpush1.bf16.msra.mxu1 %v4145_v1 }
 0x172   :  { %1139 = vmatprep.subr.bf16.mxu0 %v4012_v40  ;;  %1180 = vmatprep.subr.bf16.mxu1 %v4151_v3 }
 0x175   :  { %1140 = vmatpush1.bf16.msra.mxu0 %v4017_v41  ;;  %1181 = vmatpush1.bf16.msra.mxu1 %v4157_v5 }
 0x176   :  { %1488 = vmatprep.subr.bf16.mxu1 %v4054_v52 }
 0x22b   :  { %v837_v4 = vpop.f32.mrb[4].mxu0  ;;  %v878_v6 = vpop.f32.mrb[12].mxu1 }
 0x22c   :  { %v889_v8 = vrot.slane %v837_v4, 6  ;;  %v839_v10 = vpop.f32.mrb[5].mxu0  ;;  %v880_v12 = vpop.f32.mrb[13].mxu1  ;;  %v891_v17 = vrot.slane %v878_v6, 6 }
 0x22d   :  { %v890_v14 = vrot.slane %v839_v10, 6  ;;  %v841_v18 = vpop.f32.mrb[6].mxu0  ;;  %v882_v7 = vpop.f32.mrb[14].mxu1  ;;  %v892_v19 = vrot.slane %v880_v12, 6 }
 0x22e   :  { %v897_v9 = vadd.f32 %v889_v8, %v4193_v48  ;;  %v842_v11 = vpop.f32.mrb[7].mxu0  ;;  %v883_v13 = vpop.f32.mrb[15].mxu1  ;;  %v899_v24 = vadd.f32 %v891_v17, %v4197_v22 }
 0x22f   :  { %v898_v15 = vadd.f32 %v890_v14, %v4191_v47  ;;  %v900_v52 = vadd.f32 %v892_v19, %v4199_v26 }
 0x230   :  { %v3181_v21 = vmul.f32 -1.442695, %v897_v9 }
 0x231   :  { %v3182_v16 = vmul.f32 -1.442695, %v898_v15  ;;  %v3183_v20 = vmul.f32 -1.442695, %v900_v52 }
 0x232   :  { %3599 = vpow2.f32 %v3181_v21 }
 0x233   :  { %3601 = vpow2.f32 %v3182_v16 }
 0x234   :  { %3603 = vpow2.f32 %v3183_v20 }
 0x235   :  { %3605 = vtanh.f32 %v899_v24 }
 0x23c   :  { %v3600_v27 = vpop.eup %3599 }
 0x23d   :  { %v3602_v29 = vpop.eup %3601  ;;  %v904_v33 = vadd.f32 1.0, %v3600_v27 }
 0x23e   :  { %v910_v34 = vadd.f32 1.0, %v3602_v29  ;;  %v3604_v35 = vpop.eup %3603 }
 0x23f   :  { %3607 = vrcp.f32 %v904_v33  ;;  %v3606_v36 = vpop.eup %3605  ;;  %v917_v50 = vadd.f32 1.0, %v3604_v35 }
 0x240   :  { %3609 = vrcp.f32 %v910_v34 }
 0x241   :  { %3611 = vrcp.f32 %v917_v50  ;;  %v4353_v50 = vld [vmem:[%s4805_s3 + $0x2c] ss:$16 sps:$4 sm:$0xff]  }
 0x249   :  { %v3608_v37 = vpop.eup %3607 }
 0x24a   :  { %v3610_v45 = vpop.eup %3609  ;;  %v924_v49 = vmul.f32 %v3608_v37, %v3606_v36 }
 0x24b   :  { %v923_v51 = vmul.f32 %v3610_v45, %v921_v43  ;;  %v3612_v6 = vpop.eup %3611  ;;  %v4341_v45 = vld [vmem:[%s4805_s3 + $0xc] ss:$16 sps:$4 sm:$0xff]  }
 0x24d   :  { %v4244_v4 = vadd.f32 %v924_v49, %v923_v51  ;;  %v4346_v49 = vld [vmem:[%s4805_s3 + $0x8] ss:$16 sps:$4 sm:$0xff]  }
 0x24e   :  { %v4358_v51 = vld [vmem:[%s4805_s3 + $0x28] ss:$16 sps:$4 sm:$0xff]  }
 0x24f   :  { %3613 = vtanh.f32 %v4244_v4  ;;  %v1243_v17 = vrot.slane %v4244_v4, 6  ;;  %v4365_v4 = vld [vmem:[%s4805_s3 + $0x4c] ss:$16 sps:$4 sm:$0xff]  }
 0x259   :  { %v3614_v8 = vpop.eup %3613 }
 0x25a   :  { %v927_v10 = vmul.f32 %v3614_v8, %v3612_v6  ;;  %v4370_v6 = vld [vmem:[%s4805_s3 + $0x48] ss:$16 sps:$4 sm:$0xff]   ;;  %v4377_v8 = vld [vmem:[%s4805_s3 + $0x6c] ss:$16 sps:$4 sm:$0xff]  }
 0x25c   :  { %928 = vst [vmem:[#allocation3] sm:$0xc] %v927_v10  ;;  %v929_v12 = vpack.c.bf16 %v927_v10, %v927_v10  ;;  %v4382_v10 = vld [vmem:[%s4805_s3 + $0x68] ss:$16 sps:$4 sm:$0xff]  }
 0x25e   :  { %v963_v14 = vrot.slane %v929_v12, 1  ;;  %v4388_v12 = vld [vmem:[%s4805_s3 + $0x80] ss:$16 sps:$4 sm:$0xff]  }
 0x260   :  { %1158 = vmatmul.mubr.bf16.vlgmr.msra.gmra.mrb[8].mxu0 %v963_v14  ;;  %1199 = vmatmul.mubr.bf16.vlgmr.msra.gmra.mrb[16].mxu1 %v963_v14  ;;  %v4393_v14 = vld [vmem:[%s4805_s3 + $0x84] ss:$16 sps:$4 sm:$0xff]  }
 0x261   :  { %1489 = vmatpush1.bf16.msra.mxu1 %v4061_v53  ;;  %1479 = vmatprep.mubr.bf16.mxu0 %v3744_v2  ;;  %v4267_v53 = vld [vmem:[%s4805_s3 + $0x4] ss:$16 sps:$4 sm:$0xff]  }
 0x262   :  { %1490 = vmatprep.subr.bf16.mxu1 %v4066_v54  ;;  %1520 = vmatprep.mubr.bf16.mxu1 %v3744_v2  ;;  %v4272_v54 = vld [vmem:[%s4805_s3] ss:$16 sps:$4 sm:$0xff]  }
 0x263   :  { %1447 = vmatprep.subr.bf16.mxu0 %v4267_v53 }
 0x264   :  { %1448 = vmatpush1.bf16.msra.mxu0 %v4272_v54 }
 0x265   :  { %1491 = vmatpush1.bf16.msra.mxu1 %v4074_v55  ;;  %v4279_v55 = vld [vmem:[%s4805_s3 + $0x24] ss:$16 sps:$4 sm:$0xff]  }
 0x266   :  { %1492 = vmatprep.subr.bf16.mxu1 %v4080_v56  ;;  %v4284_v56 = vld [vmem:[%s4805_s3 + $0x20] ss:$16 sps:$4 sm:$0xff]   ;;  %1449 = vmatprep.subr.bf16.mxu0 %v4279_v55 }
 0x268   :  { %1450 = vmatpush1.bf16.msra.mxu0 %v4284_v56 }
 0x269   :  { %1493 = vmatpush1.bf16.msra.mxu1 %v4090_v57  ;;  %v4291_v57 = vld [vmem:[%s4805_s3 + $0x44] ss:$16 sps:$4 sm:$0xff]  }
 0x26a   :  { %1494 = vmatprep.subr.bf16.mxu1 %v4095_v58  ;;  %v4296_v58 = vld [vmem:[%s4805_s3 + $0x40] ss:$16 sps:$4 sm:$0xff]   ;;  %1451 = vmatprep.subr.bf16.mxu0 %v4291_v57 }
 0x26c   :  { %1452 = vmatpush1.bf16.msra.mxu0 %v4296_v58 }
 0x26d   :  { %1495 = vmatpush1.bf16.msra.mxu1 %v4106_v59  ;;  %v4303_v59 = vld [vmem:[%s4805_s3 + $0x64] ss:$16 sps:$4 sm:$0xff]  }
 0x26e   :  { %1496 = vmatprep.subr.bf16.mxu1 %v4113_v60  ;;  %v4308_v60 = vld [vmem:[%s4805_s3 + $0x60] ss:$16 sps:$4 sm:$0xff]   ;;  %1453 = vmatprep.subr.bf16.mxu0 %v4303_v59 }
 0x270   :  { %1454 = vmatpush1.bf16.msra.mxu0 %v4308_v60 }
 0x271   :  { %1497 = vmatpush1.bf16.msra.mxu1 %v4120_v61  ;;  %1455 = vmatprep.subr.bf16.mxu0 %v3915_v23 }
 0x272   :  { %1498 = vmatprep.subr.bf16.mxu1 %v4127_v62 }
 0x274   :  { %1456 = vmatpush1.bf16.msra.mxu0 %v3934_v25 }
 0x275   :  { %1499 = vmatpush1.bf16.msra.mxu1 %v4133_v63  ;;  %1457 = vmatprep.subr.bf16.mxu0 %v3966_v31 }
 0x276   :  { %1500 = vmatprep.subr.bf16.mxu1 %v4139_v0 }
 0x278   :  { %1458 = vmatpush1.bf16.msra.mxu0 %v3971_v32 }
 0x279   :  { %1501 = vmatpush1.bf16.msra.mxu1 %v4145_v1  ;;  %1459 = vmatprep.subr.bf16.mxu0 %v3999_v38 }
 0x27a   :  { %1502 = vmatprep.subr.bf16.mxu1 %v4151_v3 }
 0x27c   :  { %1460 = vmatpush1.bf16.msra.mxu0 %v4005_v39 }
 0x27d   :  { %1503 = vmatpush1.bf16.msra.mxu1 %v4157_v5  ;;  %1461 = vmatprep.subr.bf16.mxu0 %v4012_v40 }
 0x27e   :  { %1810 = vmatprep.subr.bf16.mxu1 %v4341_v45 }
 0x280   :  { %1462 = vmatpush1.bf16.msra.mxu0 %v4017_v41 }
 0x281   :  { %1769 = vmatprep.subr.bf16.mxu0 %v4267_v53 }
 0x333   :  { %v1159_v61 = vpop.f32.mrb[8].mxu0  ;;  %v1200_v62 = vpop.f32.mrb[16].mxu1 }
 0x334   :  { %v1211_v63 = vrot.slane %v1159_v61, 4  ;;  %v1161_v23 = vpop.f32.mrb[9].mxu0  ;;  %v1202_v0 = vpop.f32.mrb[17].mxu1  ;;  %v1213_v18 = vrot.slane %v1200_v62, 4  ;;  %v4399_v61 = vld [vmem:[%s4805_s3 + $0x88] ss:$16 sps:$4 sm:$0xff]  }
 0x335   :  { %v1212_v25 = vrot.slane %v1161_v23, 4  ;;  %v1163_v1 = vpop.f32.mrb[10].mxu0  ;;  %v1204_v31 = vpop.f32.mrb[18].mxu1  ;;  %v1214_v42 = vrot.slane %v1202_v0, 4  ;;  %v4404_v62 = vld [vmem:[%s4805_s3 + $0x8c] ss:$16 sps:$4 sm:$0xff]  }
 0x336   :  { %v1219_v32 = vadd.f32 %v1211_v63, %v4193_v48  ;;  %v1164_v3 = vpop.f32.mrb[11].mxu0  ;;  %v1205_v38 = vpop.f32.mrb[19].mxu1  ;;  %v1221_v9 = vadd.f32 %v1213_v18, %v4197_v22  ;;  %v4409_v63 = vld [vmem:[%s4805_s3 + $0xa4] ss:$16 sps:$4 sm:$0xff]   ;;  %v4415_v23 = vld [vmem:[%s4805_s3 + $0xac] ss:$16 sps:$4 sm:$0xff]  }
 0x337   :  { %v1220_v39 = vadd.f32 %v1212_v25, %v4191_v47  ;;  %v1222_v41 = vadd.f32 %v1214_v42, %v4199_v26  ;;  %v4422_v0 = vld [vmem:[%s4805_s3 + $0xa0] ss:$16 sps:$4 sm:$0xff]   ;;  %v4428_v25 = vld [vmem:[%s4805_s3 + $0xc4] ss:$16 sps:$4 sm:$0xff]   ;;  %v4434_v1 = vld [vmem:[%s4805_s3 + $0xa8] ss:$16 sps:$4 sm:$0xff]  }
 0x338   :  { %v3216_v5 = vmul.f32 -1.442695, %v1219_v32  ;;  %v4440_v31 = vld [vmem:[%s4805_s3 + $0xcc] ss:$16 sps:$4 sm:$0xff]   ;;  %v4446_v32 = vld [vmem:[%s4805_s3 + $0xc0] ss:$16 sps:$4 sm:$0xff]  }
 0x339   :  { %v3217_v40 = vmul.f32 -1.442695, %v1220_v39  ;;  %v3218_v7 = vmul.f32 -1.442695, %v1222_v41  ;;  %v4452_v3 = vld [vmem:[%s4805_s3 + $0xe4] ss:$16 sps:$4 sm:$0xff]  }
 0x33a   :  { %3615 = vpow2.f32 %v3216_v5  ;;  %v4458_v38 = vld [vmem:[%s4805_s3 + $0xc8] ss:$16 sps:$4 sm:$0xff]   ;;  %v4464_v39 = vld [vmem:[%s4805_s3 + $0xec] ss:$16 sps:$4 sm:$0xff]   ;;  %v4470_v5 = vld [vmem:[%s4805_s3 + $0xe0] ss:$16 sps:$4 sm:$0xff]  }
 0x33b   :  { %3617 = vpow2.f32 %v3217_v40  ;;  %v4477_v40 = vld [vmem:[%s4805_s3 + $0xe8] ss:$16 sps:$4 sm:$0xff]  }
 0x33c   :  { %3619 = vpow2.f32 %v3218_v7 }
 0x33d   :  { %3621 = vtanh.f32 %v1221_v9 }
 0x344   :  { %v3616_v11 = vpop.eup %3615 }
 0x345   :  { %v3618_v13 = vpop.eup %3617  ;;  %v1226_v15 = vadd.f32 1.0, %v3616_v11 }
 0x346   :  { %v1232_v21 = vadd.f32 1.0, %v3618_v13  ;;  %v3620_v16 = vpop.eup %3619 }
 0x347   :  { %3623 = vrcp.f32 %v1226_v15  ;;  %v3622_v19 = vpop.eup %3621  ;;  %v1239_v27 = vadd.f32 1.0, %v3620_v16 }
 0x348   :  { %3625 = vrcp.f32 %v1232_v21 }
 0x349   :  { %3627 = vrcp.f32 %v1239_v27 }
 0x351   :  { %v3624_v52 = vpop.eup %3623 }
 0x352   :  { %v3626_v20 = vpop.eup %3625  ;;  %v1246_v24 = vmul.f32 %v3624_v52, %v3622_v19 }
 0x353   :  { %v1245_v29 = vmul.f32 %v3626_v20, %v1243_v17  ;;  %v3628_v34 = vpop.eup %3627 }
 0x355   :  { %v4326_v33 = vadd.f32 %v1246_v24, %v1245_v29 }
 0x357   :  { %3629 = vtanh.f32 %v4326_v33 }
 0x361   :  { %v3630_v35 = vpop.eup %3629 }
 0x362   :  { %v1249_v36 = vmul.f32 %v3630_v35, %v3628_v34 }
 0x364   :  { %1250 = vst [vmem:[#allocation3] sm:$0x30] %v1249_v36  ;;  %v1251_v37 = vpack.c.bf16 %v1249_v36, %v1249_v36 }
 0x366   :  { %v1285_v43 = vrot.slane %v1251_v37, 2 }
 0x368   :  { %1480 = vmatmul.mubr.bf16.vlgmr.msra.gmra.mrb[12].mxu0 %v1285_v43  ;;  %1521 = vmatmul.mubr.bf16.vlgmr.msra.gmra.mrb[20].mxu1 %v1285_v43 }
 0x369   :  { %1770 = vmatpush1.bf16.msra.mxu0 %v4272_v54  ;;  %1801 = vmatprep.mubr.bf16.mxu0 %v3744_v2 }
 0x36a   :  { %1771 = vmatprep.subr.bf16.mxu0 %v4279_v55  ;;  %1842 = vmatprep.mubr.bf16.mxu1 %v3744_v2 }
 0x36b   :  { %1811 = vmatpush1.bf16.msra.mxu1 %v4346_v49 }
 0x36c   :  { %1812 = vmatprep.subr.bf16.mxu1 %v4353_v50 }
 0x36d   :  { %1772 = vmatpush1.bf16.msra.mxu0 %v4284_v56 }
 0x36e   :  { %1773 = vmatprep.subr.bf16.mxu0 %v4291_v57 }
 0x36f   :  { %1813 = vmatpush1.bf16.msra.mxu1 %v4358_v51 }
 0x370   :  { %1814 = vmatprep.subr.bf16.mxu1 %v4365_v4 }
 0x371   :  { %1774 = vmatpush1.bf16.msra.mxu0 %v4296_v58 }
 0x372   :  { %1775 = vmatprep.subr.bf16.mxu0 %v4303_v59 }
 0x373   :  { %1815 = vmatpush1.bf16.msra.mxu1 %v4370_v6 }
 0x374   :  { %1816 = vmatprep.subr.bf16.mxu1 %v4377_v8 }
 0x375   :  { %1776 = vmatpush1.bf16.msra.mxu0 %v4308_v60 }
 0x376   :  { %1777 = vmatprep.subr.bf16.mxu0 %v4393_v14 }
 0x377   :  { %1817 = vmatpush1.bf16.msra.mxu1 %v4382_v10 }
 0x378   :  { %1818 = vmatprep.subr.bf16.mxu1 %v4404_v62 }
 0x379   :  { %1778 = vmatpush1.bf16.msra.mxu0 %v4388_v12 }
 0x37a   :  { %1779 = vmatprep.subr.bf16.mxu0 %v4409_v63 }
 0x37b   :  { %1819 = vmatpush1.bf16.msra.mxu1 %v4399_v61 }
 0x37c   :  { %1820 = vmatprep.subr.bf16.mxu1 %v4415_v23 }
 0x37d   :  { %1780 = vmatpush1.bf16.msra.mxu0 %v4422_v0 }
 0x37e   :  { %1781 = vmatprep.subr.bf16.mxu0 %v4428_v25 }
 0x37f   :  { %1821 = vmatpush1.bf16.msra.mxu1 %v4434_v1 }
 0x380   :  { %1822 = vmatprep.subr.bf16.mxu1 %v4440_v31 }
 0x381   :  { %1782 = vmatpush1.bf16.msra.mxu0 %v4446_v32 }
 0x382   :  { %1783 = vmatprep.subr.bf16.mxu0 %v4452_v3 }
 0x383   :  { %1823 = vmatpush1.bf16.msra.mxu1 %v4458_v38 }
 0x384   :  { %1824 = vmatprep.subr.bf16.mxu1 %v4464_v39 }
 0x385   :  { %1784 = vmatpush1.bf16.msra.mxu0 %v4470_v5 }
 0x386   :  { %2076 = vmatprep.subr.bf16.mxu0 %v4267_v53 }
 0x387   :  { %1825 = vmatpush1.bf16.msra.mxu1 %v4477_v40 }
 0x388   :  { %2117 = vmatprep.subr.bf16.mxu1 %v4341_v45 }
 0x43b   :  { %v1481_v42 = vpop.f32.mrb[12].mxu0  ;;  %v1522_v41 = vpop.f32.mrb[20].mxu1 }
 0x43c   :  { %v1533_v18 = vrot.slane %v1481_v42, 2  ;;  %v1483_v7 = vpop.f32.mrb[13].mxu0  ;;  %v1524_v9 = vpop.f32.mrb[21].mxu1  ;;  %v1535_v29 = vrot.slane %v1522_v41, 2 }
 0x43d   :  { %v1534_v11 = vrot.slane %v1483_v7, 2  ;;  %v1485_v13 = vpop.f32.mrb[14].mxu0  ;;  %v1526_v15 = vpop.f32.mrb[22].mxu1  ;;  %v1536_v24 = vrot.slane %v1524_v9, 2  ;;  %v1565_v7 = vrot.slane %v4326_v33, 6 }
 0x43e   :  { %v1541_v21 = vadd.f32 %v1533_v18, %v4193_v48  ;;  %v1486_v16 = vpop.f32.mrb[15].mxu0  ;;  %v1527_v19 = vpop.f32.mrb[23].mxu1  ;;  %v1543_v35 = vadd.f32 %v1535_v29, %v4197_v22 }
 0x43f   :  { %v1542_v52 = vadd.f32 %v1534_v11, %v4191_v47  ;;  %v1544_v27 = vadd.f32 %v1536_v24, %v4199_v26 }
 0x440   :  { %v3251_v17 = vmul.f32 -1.442695, %v1541_v21 }
 0x441   :  { %v3252_v20 = vmul.f32 -1.442695, %v1542_v52  ;;  %v3253_v34 = vmul.f32 -1.442695, %v1544_v27 }
 0x442   :  { %3631 = vpow2.f32 %v3251_v17 }
 0x443   :  { %3633 = vpow2.f32 %v3252_v20 }
 0x444   :  { %3635 = vpow2.f32 %v3253_v34 }
 0x445   :  { %3637 = vtanh.f32 %v1543_v35 }
 0x44c   :  { %v3632_v36 = vpop.eup %3631 }
 0x44d   :  { %v3634_v37 = vpop.eup %3633  ;;  %v1548_v43 = vadd.f32 1.0, %v3632_v36 }
 0x44e   :  { %v1554_v48 = vadd.f32 1.0, %v3634_v37  ;;  %v3636_v47 = vpop.eup %3635 }
 0x44f   :  { %3639 = vrcp.f32 %v1548_v43  ;;  %v3638_v42 = vpop.eup %3637  ;;  %v1561_v26 = vadd.f32 1.0, %v3636_v47 }
 0x450   :  { %3641 = vrcp.f32 %v1554_v48 }
 0x451   :  { %3643 = vrcp.f32 %v1561_v26 }
 0x459   :  { %v3640_v18 = vpop.eup %3639 }
 0x45a   :  { %v3642_v9 = vpop.eup %3641  ;;  %v1568_v11 = vmul.f32 %v3640_v18, %v3638_v42 }
 0x45b   :  { %v1567_v41 = vmul.f32 %v3642_v9, %v1565_v7  ;;  %v3644_v22 = vpop.eup %3643 }
 0x45d   :  { %v4489_v13 = vadd.f32 %v1568_v11, %v1567_v41 }
 0x45f   :  { %3645 = vtanh.f32 %v4489_v13 }
 0x469   :  { %v3646_v15 = vpop.eup %3645 }
 0x46a   :  { %v1571_v21 = vmul.f32 %v3646_v15, %v3644_v22  ;;  %v1875_v22 = vrot.slane %v4489_v13, 6 }
 0x46c   :  { %1572 = vst [vmem:[#allocation3] sm:$0xc0] %v1571_v21  ;;  %v1573_v16 = vpack.c.bf16 %v1571_v21, %v1571_v21 }
 0x46e   :  { %v1607_v19 = vrot.slane %v1573_v16, 3 }
 0x470   :  { %1802 = vmatmul.mubr.bf16.vlgmr.msra.gmra.mrb[16].mxu0 %v1607_v19  ;;  %1843 = vmatmul.mubr.bf16.vlgmr.msra.gmra.mrb[24].mxu1 %v1607_v19 }
 0x471   :  { %2077 = vmatpush1.bf16.msra.mxu0 %v4272_v54  ;;  %2118 = vmatpush1.bf16.msra.mxu1 %v4346_v49 }
 0x472   :  { %2078 = vmatprep.subr.bf16.mxu0 %v4279_v55  ;;  %2119 = vmatprep.subr.bf16.mxu1 %v4353_v50 }
 0x473   :  { %2108 = vmatprep.mubr.bf16.mxu0 %v3744_v2  ;;  %2149 = vmatprep.mubr.bf16.mxu1 %v3744_v2 }
 0x475   :  { %2079 = vmatpush1.bf16.msra.mxu0 %v4284_v56  ;;  %2120 = vmatpush1.bf16.msra.mxu1 %v4358_v51 }
 0x476   :  { %2080 = vmatprep.subr.bf16.mxu0 %v4291_v57  ;;  %2121 = vmatprep.subr.bf16.mxu1 %v4365_v4 }
 0x479   :  { %2081 = vmatpush1.bf16.msra.mxu0 %v4296_v58  ;;  %2122 = vmatpush1.bf16.msra.mxu1 %v4370_v6 }
 0x47a   :  { %2082 = vmatprep.subr.bf16.mxu0 %v4303_v59  ;;  %2123 = vmatprep.subr.bf16.mxu1 %v4377_v8 }
 0x47d   :  { %2083 = vmatpush1.bf16.msra.mxu0 %v4308_v60  ;;  %2124 = vmatpush1.bf16.msra.mxu1 %v4382_v10 }
 0x47e   :  { %2084 = vmatprep.subr.bf16.mxu0 %v4393_v14  ;;  %2125 = vmatprep.subr.bf16.mxu1 %v4404_v62 }
 0x481   :  { %2085 = vmatpush1.bf16.msra.mxu0 %v4388_v12  ;;  %2126 = vmatpush1.bf16.msra.mxu1 %v4399_v61 }
 0x482   :  { %2086 = vmatprep.subr.bf16.mxu0 %v4409_v63  ;;  %2127 = vmatprep.subr.bf16.mxu1 %v4415_v23 }
 0x485   :  { %2087 = vmatpush1.bf16.msra.mxu0 %v4422_v0  ;;  %2128 = vmatpush1.bf16.msra.mxu1 %v4434_v1 }
 0x486   :  { %2088 = vmatprep.subr.bf16.mxu0 %v4428_v25  ;;  %2129 = vmatprep.subr.bf16.mxu1 %v4440_v31 }
 0x489   :  { %2089 = vmatpush1.bf16.msra.mxu0 %v4446_v32  ;;  %2130 = vmatpush1.bf16.msra.mxu1 %v4458_v38 }
 0x48a   :  { %2090 = vmatprep.subr.bf16.mxu0 %v4452_v3  ;;  %2131 = vmatprep.subr.bf16.mxu1 %v4464_v39 }
 0x48d   :  { %2091 = vmatpush1.bf16.msra.mxu0 %v4470_v5  ;;  %2132 = vmatpush1.bf16.msra.mxu1 %v4477_v40 }
 0x48e   :  { %2398 = vmatprep.subr.bf16.mxu0 %v4267_v53  ;;  %2439 = vmatprep.subr.bf16.mxu1 %v4341_v45 }
 0x543   :  { %v1803_v33 = vpop.f32.mrb[16].mxu0  ;;  %v1844_v52 = vpop.f32.mrb[24].mxu1 }
 0x544   :  { %v1851_v17 = vadd.f32 %v1803_v33, %v4183_v28  ;;  %v1805_v20 = vpop.f32.mrb[17].mxu0  ;;  %v1846_v24 = vpop.f32.mrb[25].mxu1  ;;  %v1853_v47 = vadd.f32 %v1844_v52, %v4187_v44 }
 0x545   :  { %v1852_v27 = vadd.f32 %v1805_v20, %v4185_v30  ;;  %v1807_v29 = vpop.f32.mrb[18].mxu0  ;;  %v1848_v34 = vpop.f32.mrb[26].mxu1  ;;  %v1854_v53 = vadd.f32 %v1846_v24, %v4189_v46 }
 0x546   :  { %v3286_v35 = vmul.f32 -1.442695, %v1851_v17  ;;  %v1808_v36 = vpop.f32.mrb[19].mxu0  ;;  %v1849_v37 = vpop.f32.mrb[27].mxu1 }
 0x547   :  { %v3287_v43 = vmul.f32 -1.442695, %v1852_v27  ;;  %v3288_v48 = vmul.f32 -1.442695, %v1854_v53 }
 0x548   :  { %3647 = vpow2.f32 %v3286_v35 }
 0x549   :  { %3649 = vpow2.f32 %v3287_v43 }
 0x54a   :  { %3651 = vpow2.f32 %v3288_v48 }
 0x54b   :  { %3653 = vtanh.f32 %v1853_v47 }
 0x552   :  { %v3648_v42 = vpop.eup %3647 }
 0x553   :  { %v3650_v18 = vpop.eup %3649  ;;  %v1858_v7 = vadd.f32 1.0, %v3648_v42 }
 0x554   :  { %v1864_v9 = vadd.f32 1.0, %v3650_v18  ;;  %v3652_v11 = vpop.eup %3651 }
 0x555   :  { %3655 = vrcp.f32 %v1858_v7  ;;  %v3654_v26 = vpop.eup %3653  ;;  %v1871_v16 = vadd.f32 1.0, %v3652_v11 }
 0x556   :  { %3657 = vrcp.f32 %v1864_v9 }
 0x557   :  { %3659 = vrcp.f32 %v1871_v16 }
 0x55f   :  { %v3656_v41 = vpop.eup %3655 }
 0x560   :  { %v3658_v15 = vpop.eup %3657  ;;  %v1878_v21 = vmul.f32 %v3656_v41, %v3654_v26 }
 0x561   :  { %v1877_v19 = vmul.f32 %v3658_v15, %v1875_v22  ;;  %v3660_v52 = vpop.eup %3659 }
 0x563   :  { %v4531_v33 = vadd.f32 %v1878_v21, %v1877_v19 }
 0x565   :  { %3661 = vtanh.f32 %v4531_v33  ;;  %v2194_v22 = vrot.slane %v4531_v33, 6 }
 0x56f   :  { %v3662_v17 = vpop.eup %3661 }
 0x570   :  { %v1881_v20 = vmul.f32 %v3662_v17, %v3660_v52 }
 0x572   :  { %1882 = vst [vmem:[#allocation3 + $0x8] sm:$0x3] %v1881_v20  ;;  %v1883_v24 = vpack.c.bf16 %v1881_v20, %v1881_v20 }
 0x574   :  { %2109 = vmatmul.mubr.bf16.vlgmr.msra.gmra.mrb[20].mxu0 %v1883_v24  ;;  %2150 = vmatmul.mubr.bf16.vlgmr.msra.gmra.mrb[28].mxu1 %v1883_v24 }
 0x575   :  { %2399 = vmatpush1.bf16.msra.mxu0 %v4272_v54  ;;  %2440 = vmatpush1.bf16.msra.mxu1 %v4346_v49 }
 0x576   :  { %2400 = vmatprep.subr.bf16.mxu0 %v4279_v55  ;;  %2441 = vmatprep.subr.bf16.mxu1 %v4353_v50 }
 0x577   :  { %2430 = vmatprep.mubr.bf16.mxu0 %v3744_v2  ;;  %2471 = vmatprep.mubr.bf16.mxu1 %v3744_v2 }
 0x579   :  { %2401 = vmatpush1.bf16.msra.mxu0 %v4284_v56  ;;  %2442 = vmatpush1.bf16.msra.mxu1 %v4358_v51 }
 0x57a   :  { %2402 = vmatprep.subr.bf16.mxu0 %v4291_v57  ;;  %2443 = vmatprep.subr.bf16.mxu1 %v4365_v4 }
 0x57d   :  { %2403 = vmatpush1.bf16.msra.mxu0 %v4296_v58  ;;  %2444 = vmatpush1.bf16.msra.mxu1 %v4370_v6 }
 0x57e   :  { %2404 = vmatprep.subr.bf16.mxu0 %v4303_v59  ;;  %2445 = vmatprep.subr.bf16.mxu1 %v4377_v8 }
 0x581   :  { %2405 = vmatpush1.bf16.msra.mxu0 %v4308_v60  ;;  %2446 = vmatpush1.bf16.msra.mxu1 %v4382_v10 }
 0x582   :  { %2406 = vmatprep.subr.bf16.mxu0 %v4393_v14  ;;  %2447 = vmatprep.subr.bf16.mxu1 %v4404_v62 }
 0x585   :  { %2407 = vmatpush1.bf16.msra.mxu0 %v4388_v12  ;;  %2448 = vmatpush1.bf16.msra.mxu1 %v4399_v61 }
 0x586   :  { %2408 = vmatprep.subr.bf16.mxu0 %v4409_v63  ;;  %2449 = vmatprep.subr.bf16.mxu1 %v4415_v23 }
 0x589   :  { %2409 = vmatpush1.bf16.msra.mxu0 %v4422_v0  ;;  %2450 = vmatpush1.bf16.msra.mxu1 %v4434_v1 }
 0x58a   :  { %2410 = vmatprep.subr.bf16.mxu0 %v4428_v25  ;;  %2451 = vmatprep.subr.bf16.mxu1 %v4440_v31 }
 0x58d   :  { %2411 = vmatpush1.bf16.msra.mxu0 %v4446_v32  ;;  %2452 = vmatpush1.bf16.msra.mxu1 %v4458_v38 }
 0x58e   :  { %2412 = vmatprep.subr.bf16.mxu0 %v4452_v3  ;;  %2453 = vmatprep.subr.bf16.mxu1 %v4464_v39 }
 0x591   :  { %2413 = vmatpush1.bf16.msra.mxu0 %v4470_v5  ;;  %2454 = vmatpush1.bf16.msra.mxu1 %v4477_v40 }
 0x592   :  { %2761 = vmatprep.subr.bf16.mxu1 %v4341_v45 }
 0x647   :  { %v2110_v54 = vpop.f32.mrb[20].mxu0  ;;  %v2151_v55 = vpop.f32.mrb[28].mxu1 }
 0x648   :  { %v2162_v56 = vrot.slane %v2110_v54, 6  ;;  %v2112_v57 = vpop.f32.mrb[21].mxu0  ;;  %v2153_v58 = vpop.f32.mrb[29].mxu1  ;;  %v2164_v53 = vrot.slane %v2151_v55, 6 }
 0x649   :  { %v2163_v59 = vrot.slane %v2112_v57, 6  ;;  %v2114_v60 = vpop.f32.mrb[22].mxu0  ;;  %v2155_v13 = vpop.f32.mrb[30].mxu1  ;;  %v2165_v43 = vrot.slane %v2153_v58, 6 }
 0x64a   :  { %v2170_v27 = vadd.f32 %v2162_v56, %v4183_v28  ;;  %v2115_v29 = vpop.f32.mrb[23].mxu0  ;;  %v2156_v34 = vpop.f32.mrb[31].mxu1  ;;  %v2172_v47 = vadd.f32 %v2164_v53, %v4187_v44 }
 0x64b   :  { %v2171_v35 = vadd.f32 %v2163_v59, %v4185_v30  ;;  %v2173_v45 = vadd.f32 %v2165_v43, %v4189_v46 }
 0x64c   :  { %v3321_v36 = vmul.f32 -1.442695, %v2170_v27 }
 0x64d   :  { %v3322_v37 = vmul.f32 -1.442695, %v2171_v35  ;;  %v3323_v48 = vmul.f32 -1.442695, %v2173_v45 }
 0x64e   :  { %3663 = vpow2.f32 %v3321_v36 }
 0x64f   :  { %3665 = vpow2.f32 %v3322_v37 }
 0x650   :  { %3667 = vpow2.f32 %v3323_v48 }
 0x651   :  { %3669 = vtanh.f32 %v2172_v47 }
 0x658   :  { %v3664_v42 = vpop.eup %3663 }
 0x659   :  { %v3666_v18 = vpop.eup %3665  ;;  %v2177_v7 = vadd.f32 1.0, %v3664_v42 }
 0x65a   :  { %v2183_v9 = vadd.f32 1.0, %v3666_v18  ;;  %v3668_v11 = vpop.eup %3667 }
 0x65b   :  { %3671 = vrcp.f32 %v2177_v7  ;;  %v3670_v26 = vpop.eup %3669  ;;  %v2190_v16 = vadd.f32 1.0, %v3668_v11  ;;  %v3745_v11 = vmov 0.0  }
 0x65c   :  { %3673 = vrcp.f32 %v2183_v9  ;;  %v3575_v9 = vld [vmem:[%s4807_s5] sm:$0xff]  }
 0x65d   :  { %3675 = vrcp.f32 %v2190_v16  ;;  %v3581_v16 = vld [vmem:[%s4807_s5 + $0x30] sm:$0xff]  }
 0x665   :  { %v3672_v41 = vpop.eup %3671 }
 0x666   :  { %v3674_v15 = vpop.eup %3673  ;;  %v2197_v21 = vmul.f32 %v3672_v41, %v3670_v26  ;;  %v3576_v26 = vld [vmem:[%s4807_s5 + $0x8] sm:$0xff]   ;;  %v3577_v41 = vld [vmem:[%s4807_s5 + $0x10] sm:$0xff]  }
 0x667   :  { %v2196_v19 = vmul.f32 %v3674_v15, %v2194_v22  ;;  %v3676_v17 = vpop.eup %3675  ;;  %v3578_v22 = vld [vmem:[%s4807_s5 + $0x18] sm:$0xff]   ;;  %v3579_v15 = vld [vmem:[%s4807_s5 + $0x20] sm:$0xff]  }
 0x669   :  { %v4572_v52 = vadd.f32 %v2197_v21, %v2196_v19  ;;  %v3580_v21 = vld [vmem:[%s4807_s5 + $0x28] sm:$0xff]   ;;  %v3582_v19 = vld [vmem:[%s4807_s5 + $0x38] sm:$0xff]  }
 0x66b   :  { %3677 = vtanh.f32 %v4572_v52  ;;  %v2516_v35 = vrot.slane %v4572_v52, 6 }
 0x675   :  { %v3678_v20 = vpop.eup %3677 }
 0x676   :  { %v2200_v24 = vmul.f32 %v3678_v20, %v3676_v17 }
 0x678   :  { %2201 = vst [vmem:[#allocation3 + $0x8] sm:$0xc] %v2200_v24  ;;  %v2202_v54 = vpack.c.bf16 %v2200_v24, %v2200_v24 }
 0x67a   :  { %v2236_v55 = vrot.slane %v2202_v54, 1 }
 0x67c   :  { %2431 = vmatmul.mubr.bf16.vlgmr.msra.gmra.mrb[24].mxu0 %v2236_v55  ;;  %2472 = vmatmul.mubr.bf16.vlgmr.msra.gmra.mrb[32].mxu1 %v2236_v55 }
 0x67d   :  { %2762 = vmatpush1.bf16.msra.mxu1 %v4346_v49  ;;  %2752 = vmatprep.mubr.bf16.mxu0 %v3744_v2  ;;  %v3563_v49 = vld [vmem:[%s4805_s3] ss:$16 sps:$4 sm:$0xff]  }
 0x67e   :  { %2763 = vmatprep.subr.bf16.mxu1 %v4353_v50  ;;  %2793 = vmatprep.mubr.bf16.mxu1 %v3744_v2  ;;  %v3565_v2 = vld [vmem:[%s4805_s3 + $0x4] ss:$16 sps:$4 sm:$0xff]  }
 0x67f   :  { %2720 = vmatprep.subr.bf16.mxu0 %v3565_v2  ;;  %v3568_v50 = vld [vmem:[%s4805_s3 + $0x24] ss:$16 sps:$4 sm:$0xff]  }
 0x680   :  { %2721 = vmatpush1.bf16.msra.mxu0 %v3563_v49 }
 0x681   :  { %2764 = vmatpush1.bf16.msra.mxu1 %v4358_v51  ;;  %v3566_v51 = vld [vmem:[%s4805_s3 + $0x20] ss:$16 sps:$4 sm:$0xff]   ;;  %2722 = vmatprep.subr.bf16.mxu0 %v3568_v50 }
 0x682   :  { %2765 = vmatprep.subr.bf16.mxu1 %v4365_v4  ;;  %v3571_v4 = vld [vmem:[%s4805_s3 + $0x44] ss:$16 sps:$4 sm:$0xff]  }
 0x684   :  { %2723 = vmatpush1.bf16.msra.mxu0 %v3566_v51 }
 0x685   :  { %2766 = vmatpush1.bf16.msra.mxu1 %v4370_v6  ;;  %v3569_v6 = vld [vmem:[%s4805_s3 + $0x40] ss:$16 sps:$4 sm:$0xff]   ;;  %2724 = vmatprep.subr.bf16.mxu0 %v3571_v4 }
 0x686   :  { %2767 = vmatprep.subr.bf16.mxu1 %v4377_v8  ;;  %v3574_v8 = vld [vmem:[%s4805_s3 + $0x64] ss:$16 sps:$4 sm:$0xff]  }
 0x688   :  { %2725 = vmatpush1.bf16.msra.mxu0 %v3569_v6 }
 0x689   :  { %2768 = vmatpush1.bf16.msra.mxu1 %v4382_v10  ;;  %v3572_v10 = vld [vmem:[%s4805_s3 + $0x60] ss:$16 sps:$4 sm:$0xff]   ;;  %2726 = vmatprep.subr.bf16.mxu0 %v3574_v8 }
 0x68a   :  { %2769 = vmatprep.subr.bf16.mxu1 %v4404_v62 }
 0x68c   :  { %2727 = vmatpush1.bf16.msra.mxu0 %v3572_v10 }
 0x68d   :  { %2770 = vmatpush1.bf16.msra.mxu1 %v4399_v61  ;;  %2728 = vmatprep.subr.bf16.mxu0 %v4393_v14 }
 0x68e   :  { %2771 = vmatprep.subr.bf16.mxu1 %v4415_v23 }
 0x690   :  { %2729 = vmatpush1.bf16.msra.mxu0 %v4388_v12 }
 0x691   :  { %2772 = vmatpush1.bf16.msra.mxu1 %v4434_v1  ;;  %2730 = vmatprep.subr.bf16.mxu0 %v4409_v63 }
 0x692   :  { %2773 = vmatprep.subr.bf16.mxu1 %v4440_v31 }
 0x694   :  { %2731 = vmatpush1.bf16.msra.mxu0 %v4422_v0 }
 0x695   :  { %2774 = vmatpush1.bf16.msra.mxu1 %v4458_v38  ;;  %2732 = vmatprep.subr.bf16.mxu0 %v4428_v25 }
 0x696   :  { %2775 = vmatprep.subr.bf16.mxu1 %v4464_v39 }
 0x698   :  { %2733 = vmatpush1.bf16.msra.mxu0 %v4446_v32 }
 0x699   :  { %2776 = vmatpush1.bf16.msra.mxu1 %v4477_v40  ;;  %2734 = vmatprep.subr.bf16.mxu0 %v4452_v3 }
 0x69c   :  { %2735 = vmatpush1.bf16.msra.mxu0 %v4470_v5 }
 0x69d   :  { %3419 = vmatprep.subr.bf16.mxu0 %v3745_v11 }
 0x74f   :  { %v2432_v61 = vpop.f32.mrb[24].mxu0  ;;  %v2473_v62 = vpop.f32.mrb[32].mxu1 }
 0x750   :  { %v2484_v23 = vrot.slane %v2432_v61, 4  ;;  %v2434_v1 = vpop.f32.mrb[25].mxu0  ;;  %v2475_v31 = vpop.f32.mrb[33].mxu1  ;;  %v2486_v5 = vrot.slane %v2473_v62, 4 }
 0x751   :  { %v2485_v14 = vrot.slane %v2434_v1, 4  ;;  %v2436_v38 = vpop.f32.mrb[26].mxu0  ;;  %v2477_v12 = vpop.f32.mrb[34].mxu1  ;;  %v2487_v33 = vrot.slane %v2475_v31, 4 }
 0x752   :  { %v2492_v63 = vadd.f32 %v2484_v23, %v4183_v28  ;;  %v2437_v39 = vpop.f32.mrb[27].mxu0  ;;  %v2478_v0 = vpop.f32.mrb[35].mxu1  ;;  %v2494_v57 = vadd.f32 %v2486_v5, %v4187_v44 }
 0x753   :  { %v2493_v25 = vadd.f32 %v2485_v14, %v4185_v30  ;;  %v2495_v3 = vadd.f32 %v2487_v33, %v4189_v46 }
 0x754   :  { %v3356_v40 = vmul.f32 -1.442695, %v2492_v63 }
 0x755   :  { %v3357_v32 = vmul.f32 -1.442695, %v2493_v25  ;;  %v3358_v56 = vmul.f32 -1.442695, %v2495_v3 }
 0x756   :  { %3679 = vpow2.f32 %v3356_v40 }
 0x757   :  { %3681 = vpow2.f32 %v3357_v32 }
 0x758   :  { %3683 = vpow2.f32 %v3358_v56  ;;  %v2846_v56 = vld [vmem:[#allocation3] sm:$0xff] }
 0x759   :  { %3685 = vtanh.f32 %v2494_v57 }
 0x760   :  { %v3680_v58 = vpop.eup %3679 }
 0x761   :  { %v3682_v59 = vpop.eup %3681  ;;  %v2499_v60 = vadd.f32 1.0, %v3680_v58 }
 0x762   :  { %v2505_v13 = vadd.f32 1.0, %v3682_v59  ;;  %v3684_v27 = vpop.eup %3683  ;;  %v3394_v59 = vld [vmem:[%s4808_s6] ss:$0 sm:$0xff] }
 0x763   :  { %3687 = vrcp.f32 %v2499_v60  ;;  %v3686_v29 = vpop.eup %3685  ;;  %v2512_v43 = vadd.f32 1.0, %v3684_v27 }
 0x764   :  { %3689 = vrcp.f32 %v2505_v13 }
 0x765   :  { %3691 = vrcp.f32 %v2512_v43 }
 0x76d   :  { %v3688_v34 = vpop.eup %3687 }
 0x76e   :  { %v3690_v36 = vpop.eup %3689  ;;  %v2519_v37 = vmul.f32 %v3688_v34, %v3686_v29 }
 0x76f   :  { %v2518_v45 = vmul.f32 %v3690_v36, %v2516_v35  ;;  %v3692_v48 = vpop.eup %3691 }
 0x771   :  { %v4629_v53 = vadd.f32 %v2519_v37, %v2518_v45 }
 0x773   :  { %3693 = vtanh.f32 %v4629_v53  ;;  %v2838_v0 = vrot.slane %v4629_v53, 6 }
 0x77d   :  { %v3694_v47 = vpop.eup %3693 }
 0x77e   :  { %v2522_v42 = vmul.f32 %v3694_v47, %v3692_v48 }
 0x780   :  { %2523 = vst [vmem:[#allocation3 + $0x8] sm:$0x30] %v2522_v42  ;;  %v2524_v18 = vpack.c.bf16 %v2522_v42, %v2522_v42 }
 0x782   :  { %v2558_v7 = vrot.slane %v2524_v18, 2 }
 0x784   :  { %2753 = vmatmul.mubr.bf16.vlgmr.msra.gmra.mrb[28].mxu0 %v2558_v7  ;;  %2794 = vmatmul.mubr.bf16.vlgmr.msra.gmra.mrb[36].mxu1 %v2558_v7 }
 0x785   :  { %3420 = vmatpush3.bf16.msra.mxu0 %v3575_v9  ;;  %3435 = vmatprep.mubr.msk.bf16.mxu0 %vm3746_vm2, %v3745_v11 }
 0x786   :  { %3421 = vmatprep.subr.bf16.mxu0 %v3745_v11 }
 0x789   :  { %3422 = vmatpush3.bf16.msra.mxu0 %v3576_v26 }
 0x78a   :  { %3423 = vmatprep.subr.bf16.mxu0 %v3745_v11 }
 0x78d   :  { %3424 = vmatpush3.bf16.msra.mxu0 %v3577_v41 }
 0x78e   :  { %3425 = vmatprep.subr.bf16.mxu0 %v3745_v11 }
 0x791   :  { %3426 = vmatpush3.bf16.msra.mxu0 %v3578_v22 }
 0x792   :  { %3427 = vmatprep.subr.bf16.mxu0 %v3745_v11 }
 0x795   :  { %3428 = vmatpush3.bf16.msra.mxu0 %v3579_v15 }
 0x796   :  { %3429 = vmatprep.subr.bf16.mxu0 %v3745_v11 }
 0x799   :  { %3430 = vmatpush3.bf16.msra.mxu0 %v3580_v21 }
 0x79a   :  { %3431 = vmatprep.subr.bf16.mxu0 %v3745_v11 }
 0x79d   :  { %3432 = vmatpush3.bf16.msra.mxu0 %v3581_v16 }
 0x79e   :  { %3433 = vmatprep.subr.bf16.mxu0 %v3745_v11 }
 0x7a1   :  { %3434 = vmatpush3.bf16.msra.mxu0 %v3582_v19 }
 0x857   :  { %v2754_v52 = vpop.f32.mrb[28].mxu0  ;;  %v2795_v17 = vpop.f32.mrb[36].mxu1 }
 0x858   :  { %v2806_v20 = vrot.slane %v2754_v52, 2  ;;  %v2756_v24 = vpop.f32.mrb[29].mxu0  ;;  %v2797_v54 = vpop.f32.mrb[37].mxu1  ;;  %v2808_v23 = vrot.slane %v2795_v17, 2 }
 0x859   :  { %v2807_v55 = vrot.slane %v2756_v24, 2  ;;  %v2758_v2 = vpop.f32.mrb[30].mxu0  ;;  %v2799_v49 = vpop.f32.mrb[38].mxu1  ;;  %v2809_v61 = vrot.slane %v2797_v54, 2 }
 0x85a   :  { %v2814_v50 = vadd.f32 %v2806_v20, %v4183_v28  ;;  %v2759_v51 = vpop.f32.mrb[31].mxu0  ;;  %v2800_v4 = vpop.f32.mrb[39].mxu1  ;;  %v2816_v31 = vadd.f32 %v2808_v23, %v4187_v44 }
 0x85b   :  { %v2815_v6 = vadd.f32 %v2807_v55, %v4185_v30  ;;  %v2817_v62 = vadd.f32 %v2809_v61, %v4189_v46 }
 0x85c   :  { %v3391_v8 = vmul.f32 -1.442695, %v2814_v50 }
 0x85d   :  { %v3392_v10 = vmul.f32 -1.442695, %v2815_v6  ;;  %v3393_v1 = vmul.f32 -1.442695, %v2817_v62 }
 0x85e   :  { %3695 = vpow2.f32 %v3391_v8 }
 0x85f   :  { %3697 = vpow2.f32 %v3392_v10 }
 0x860   :  { %3699 = vpow2.f32 %v3393_v1 }
 0x861   :  { %3701 = vtanh.f32 %v2816_v31 }
 0x868   :  { %v3696_v14 = vpop.eup %3695 }
 0x869   :  { %v3698_v38 = vpop.eup %3697  ;;  %v2821_v12 = vadd.f32 1.0, %v3696_v14 }
 0x86a   :  { %v2827_v28 = vadd.f32 1.0, %v3698_v38  ;;  %v3700_v30 = vpop.eup %3699 }
 0x86b   :  { %3703 = vrcp.f32 %v2821_v12  ;;  %v3702_v63 = vpop.eup %3701  ;;  %v2834_v46 = vadd.f32 1.0, %v3700_v30 }
 0x86c   :  { %3705 = vrcp.f32 %v2827_v28 }
 0x86d   :  { %3707 = vrcp.f32 %v2834_v46 }
 0x875   :  { %v3704_v39 = vpop.eup %3703 }
 0x876   :  { %v3706_v25 = vpop.eup %3705  ;;  %v2841_v40 = vmul.f32 %v3704_v39, %v3702_v63 }
 0x877   :  { %v2840_v32 = vmul.f32 %v3706_v25, %v2838_v0  ;;  %v3708_v44 = vpop.eup %3707 }
 0x879   :  { %v2842_v33 = vadd.f32 %v2841_v40, %v2840_v32 }
 0x87b   :  { %3709 = vtanh.f32 %v2842_v33 }
 0x885   :  { %v3710_v3 = vpop.eup %3709 }
 0x886   :  { %v2844_v5 = vmul.f32 %v3710_v3, %v3708_v44 }
 0x888   :  { %2845 = vst [vmem:[#allocation3 + $0x8] sm:$0xc0] %v2844_v5 }
 0x88f   :  { %v2847_v57 = vld [vmem:[#allocation3 + $0x8] sm:$0xff] }
 0x890   :  { %v2848_v58 = vpack.c.bf16 %v2847_v57, %v2846_v56 }
 0x892   :  { %3436 = vmatmul.mubr.bf16.vlgmr.msra.gmra.mrb[32].mxu0 %v2848_v58 }
 0x965   :  { %v2954_v60 = vpop.f32.mrb[32].mxu0 }
 0x966   :  { %v2955_v13 = vadd.f32 %v3394_v59, %v2954_v60  ;;  %v3437_v27 = vpop.f32.mrb[33].mxu0 }
 0x967   :  { %v2957_v29 = vpop.f32.mrb[34].mxu0 }
 0x968   :  { %2962 = vst.msk [vmem:[%s4809_s7] sm:$0x3] %vm2961_vm3, %v2955_v13  ;;  %v2958_v34 = vadd.f32 %v3394_v59, %v2957_v29  ;;  %v3438_v35 = vpop.f32.mrb[35].mxu0 }
 0x969   :  { %3403 = vst.msk [vmem:[%s4809_s7] sm:$0xc] %vm2964_vm4, %v2955_v13 }
 0x96a   :  { %3404 = vst.msk [vmem:[%s4809_s7] sm:$0x30] %vm2967_vm5, %v2955_v13  ;;  %3408 = vst.msk [vmem:[%s4809_s7 + $0x8] sm:$0x30] %vm2967_vm5, %v2958_v34 }
 0x96b   :  { %3405 = vst.msk [vmem:[%s4809_s7] sm:$0xc0] %vm2970_vm6, %v2955_v13  ;;  %3409 = vst.msk [vmem:[%s4809_s7 + $0x8] sm:$0xc0] %vm2970_vm6, %v2958_v34 }
 0x96c   :  { %3406 = vst.msk [vmem:[%s4809_s7 + $0x8] sm:$0x3] %vm2961_vm3, %v2958_v34 }
 0x96d   :  { %3407 = vst.msk [vmem:[%s4809_s7 + $0x8] sm:$0xc] %vm2964_vm4, %v2958_v34 }
 0x96f   :  { %v4693_v36 = vld [vmem:[%s4809_s7] sm:$0x3] }
 0x970   :  { %v4698_v37 = vld [vmem:[%s4809_s7 + $0x2] sm:$0x3]  ;;  %v2988_v53 = vsel %vm2961_vm3, %v4693_v36, -inf }
 0x971   :  { %v4703_v43 = vld [vmem:[%s4809_s7 + $0x4] sm:$0x3]  ;;  %v2989_v48 = vsel %vm2961_vm3, %v4698_v37, -inf  ;;  %v4729_v7 = vld [vmem:[%s4809_s7 + $0xc] sm:$0x3] }
 0x972   :  { %v4708_v45 = vld [vmem:[%s4809_s7 + $0x6] sm:$0x3]  ;;  %v2990_v47 = vsel %vm2961_vm3, %v4703_v43, -inf  ;;  %v4734_v9 = vld [vmem:[%s4809_s7 + $0xe] sm:$0x3]  ;;  %v2996_v22 = vsel %vm2961_vm3, %v4729_v7, -inf }
 0x973   :  { %v4719_v42 = vld [vmem:[%s4809_s7 + $0x8] sm:$0x3]  ;;  %v2991_v11 = vsel %vm2961_vm3, %v4708_v45, -inf  ;;  %v2997_v16 = vmax.f32 %v2990_v47, %v2996_v22  ;;  %v2998_v19 = vsel %vm2961_vm3, %v4734_v9, -inf }
 0x974   :  { %v4724_v18 = vld [vmem:[%s4809_s7 + $0xa] sm:$0x3]  ;;  %v2992_v26 = vsel %vm2961_vm3, %v4719_v42, -inf  ;;  %v2999_v52 = vmax.f32 %v2991_v11, %v2998_v19 }
 0x975   :  { %v2994_v41 = vsel %vm2961_vm3, %v4724_v18, -inf  ;;  %v2993_v15 = vmax.f32 %v2988_v53, %v2992_v26 }
 0x976   :  { %v2995_v21 = vmax.f32 %v2989_v48, %v2994_v41  ;;  %v3001_v20 = vmax.f32 %v2997_v16, %v2999_v52 }
 0x978   :  { %v3000_v17 = vmax.f32 %v2993_v15, %v2995_v21 }
 0x97a   :  { %v3002_v24 = vmax.f32 %v3000_v17, %v3001_v20 }
 0x97c   :  { %v3003_v54 = vsub.f32 %v4693_v36, %v3002_v24  ;;  %v3004_v55 = vsub.f32 %v4698_v37, %v3002_v24  ;;  %v3005_v2 = vsub.f32 %v4703_v43, %v3002_v24  ;;  %v3006_v49 = vsub.f32 %v4708_v45, %v3002_v24 }
 0x97d   :  { %v3007_v50 = vsub.f32 %v4719_v42, %v3002_v24  ;;  %v3008_v8 = vsub.f32 %v4724_v18, %v3002_v24  ;;  %v3009_v61 = vsub.f32 %v4729_v7, %v3002_v24  ;;  %v3010_v23 = vsub.f32 %v4734_v9, %v3002_v24 }
 0x97e   :  { %v3011_v51 = vmul.f32 1.442695, %v3003_v54  ;;  %v3013_v4 = vmul.f32 1.442695, %v3004_v55  ;;  %v3015_v6 = vmul.f32 1.442695, %v3005_v2 }
 0x97f   :  { %v3017_v10 = vmul.f32 1.442695, %v3006_v49  ;;  %v3019_v62 = vmul.f32 1.442695, %v3007_v50  ;;  %v3021_v1 = vmul.f32 1.442695, %v3008_v8 }
 0x980   :  { %3711 = vpow2.f32 %v3011_v51  ;;  %v3023_v31 = vmul.f32 1.442695, %v3009_v61  ;;  %v3025_v14 = vmul.f32 1.442695, %v3010_v23 }
 0x981   :  { %3713 = vpow2.f32 %v3013_v4 }
 0x982   :  { %3715 = vpow2.f32 %v3015_v6 }
 0x983   :  { %3717 = vpow2.f32 %v3017_v10 }
 0x984   :  { %3719 = vpow2.f32 %v3019_v62 }
 0x985   :  { %3721 = vpow2.f32 %v3021_v1 }
 0x986   :  { %3723 = vpow2.f32 %v3023_v31 }
 0x987   :  { %3725 = vpow2.f32 %v3025_v14 }
 0x98a   :  { %v3712_v38 = vpop.eup %3711 }
 0x98b   :  { %v3714_v12 = vpop.eup %3713  ;;  %v3027_v28 = vsel %vm2961_vm3, %v3712_v38, 0.0 }
 0x98c   :  { %v3716_v30 = vpop.eup %3715  ;;  %v3028_v63 = vsel %vm2961_vm3, %v3714_v12, 0.0 }
 0x98d   :  { %v3718_v39 = vpop.eup %3717  ;;  %v3029_v0 = vadd.f32 %v3028_v63, %v3027_v28  ;;  %v3030_v25 = vsel %vm2961_vm3, %v3716_v30, 0.0 }
 0x98e   :  { %v3720_v40 = vpop.eup %3719  ;;  %v3032_v32 = vsel %vm2961_vm3, %v3718_v39, 0.0 }
 0x98f   :  { %v3031_v46 = vadd.f32 %v3030_v25, %v3029_v0  ;;  %v3722_v33 = vpop.eup %3721  ;;  %v3034_v3 = vsel %vm2961_vm3, %v3720_v40, 0.0 }
 0x990   :  { %v3724_v5 = vpop.eup %3723  ;;  %v3036_v57 = vsel %vm2961_vm3, %v3722_v33, 0.0 }
 0x991   :  { %v3033_v44 = vadd.f32 %v3032_v32, %v3031_v46  ;;  %v3726_v58 = vpop.eup %3725  ;;  %v3038_v60 = vsel %vm2961_vm3, %v3724_v5, 0.0 }
 0x992   :  { %v3040_v27 = vsel %vm2961_vm3, %v3726_v58, 0.0 }
 0x993   :  { %v3035_v56 = vadd.f32 %v3034_v3, %v3033_v44 }
 0x995   :  { %v3037_v59 = vadd.f32 %v3036_v57, %v3035_v56 }
 0x997   :  { %v3039_v13 = vadd.f32 %v3038_v60, %v3037_v59 }
 0x999   :  { %v3041_v29 = vadd.f32 %v3040_v27, %v3039_v13 }
 0x99b   :  { %3727 = vlog2.f32 %v3041_v29 }
 0x9a5   :  { %v3728_v34 = vpop.eup %3727 }
 0x9a6   :  { %v3043_v35 = vmul.f32 0.6931472, %v3728_v34 }
 0x9a8   :  { %v3044_v53 = vadd.f32 %v3043_v35, %v3002_v24 }
 0x9aa   :  { %v3045_v48 = vsub.f32 %v4693_v36, %v3044_v53  ;;  %v3046_v47 = vsub.f32 %v4698_v37, %v3044_v53  ;;  %v3047_v11 = vsub.f32 %v4703_v43, %v3044_v53  ;;  %v3048_v26 = vsub.f32 %v4708_v45, %v3044_v53 }
 0x9ab   :  { %v3049_v41 = vsub.f32 %v4719_v42, %v3044_v53  ;;  %v3050_v22 = vsub.f32 %v4724_v18, %v3044_v53  ;;  %v3051_v15 = vsub.f32 %v4729_v7, %v3044_v53  ;;  %v3052_v21 = vsub.f32 %v4734_v9, %v3044_v53 }
 0x9ac   :  { %3053 = vst.msk [vmem:[%s4809_s7] sm:$0x3] %vm2961_vm3, %v3045_v48  ;;  %3054 = vst.msk [vmem:[%s4809_s7 + $0x2] sm:$0x3] %vm2961_vm3, %v3046_v47 }
 0x9ad   :  { %3055 = vst.msk [vmem:[%s4809_s7 + $0x4] sm:$0x3] %vm2961_vm3, %v3047_v11  ;;  %3056 = vst.msk [vmem:[%s4809_s7 + $0x6] sm:$0x3] %vm2961_vm3, %v3048_v26 }
 0x9ae   :  { %3057 = vst.msk [vmem:[%s4809_s7 + $0x8] sm:$0x3] %vm2961_vm3, %v3049_v41  ;;  %3058 = vst.msk [vmem:[%s4809_s7 + $0xa] sm:$0x3] %vm2961_vm3, %v3050_v22 }
 0x9af   :  { %3059 = vst.msk [vmem:[%s4809_s7 + $0xc] sm:$0x3] %vm2961_vm3, %v3051_v15  ;;  %3060 = vst.msk [vmem:[%s4809_s7 + $0xe] sm:$0x3] %vm2961_vm3, %v3052_v21 }

</bundles_post_ra>
